<compile_context>
chip_gen: v7x
topology: tpu7x:2x2x1
jax: 0.10.0
libtpu: 0.0.40
codegen_flags: <defaults>
</compile_context>

<pallas_src>
import jax
import jax.numpy as jnp
from jax.experimental import pallas as pl
from jax.experimental.pallas import tpu as pltpu


# ----------------------------------------------------------------------------
# Pallas kernels
# ----------------------------------------------------------------------------
def _conv_gemm_silu_kernel(w_ref, p_ref, b_ref, o_ref):
    # out[Cout, Mtile] = SiLU(W[Cout, K] @ P[K, Mtile] + b[Cout, 1])
    acc = jnp.dot(w_ref[...], p_ref[...], preferred_element_type=jnp.float32)
    acc = acc + b_ref[...]                      # (Cout, 1) broadcasts over lanes
    acc = acc * jax.nn.sigmoid(acc)             # SiLU = x * sigmoid(x)
    o_ref[...] = acc.astype(o_ref.dtype)


def conv_gemm_silu(w, p, b):
    """Lane-dense conv GEMM: w [Cout, K] (bf16), p [K, M] (bf16), b [Cout] (f32).
    Returns SiLU(w @ p + b) as f32 [Cout, M]."""
    Cout, K = w.shape
    K2, M = p.shape
    assert K == K2
    # >=2 parallel grid steps so both v7x TensorCores are used; each tile is a
    # full half of the problem (M/2 is a multiple of 128 for every layer here).
    m_split = 2 if (M % 256 == 0) else 1
    tm = M // m_split
    return pl.pallas_call(
        _conv_gemm_silu_kernel,
        out_shape=jax.ShapeDtypeStruct((Cout, M), jnp.float32),
        grid=(m_split,),
        in_specs=[
            pl.BlockSpec((Cout, K), lambda i: (0, 0)),
            pl.BlockSpec((K, tm), lambda i: (0, i)),
            pl.BlockSpec((Cout, 1), lambda i: (0, 0)),
        ],
        out_specs=pl.BlockSpec((Cout, tm), lambda i: (0, i)),
        compiler_params=pltpu.CompilerParams(
            dimension_semantics=("parallel",)),
    )(w, p, b.reshape(Cout, 1))


def _max4_kernel(a_ref, b_ref, c_ref, d_ref, o_ref):
    o_ref[...] = jnp.maximum(
        jnp.maximum(a_ref[...], b_ref[...]),
        jnp.maximum(c_ref[...], d_ref[...]),
    )


def maxpool2x2_planar(y):
    """2x2 max pool, stride 2, on planar activations.
    y: [C, B, H, W] -> [C, B, H//2, W//2].  Operands are reshaped so the last
    dim (B*H2*W2) is a multiple of 128 -> lane-dense loads/stores."""
    C, B, H, W = y.shape
    H2, W2 = H // 2, W // 2
    quads = [
        y[:, :, 0::2, 0::2], y[:, :, 0::2, 1::2],
        y[:, :, 1::2, 0::2], y[:, :, 1::2, 1::2],
    ]
    shape = (C, B * H2 * W2)
    quads = [q.reshape(shape) for q in quads]
    spec = pl.BlockSpec(shape, lambda i: (0, 0))
    out = pl.pallas_call(
        _max4_kernel,
        out_shape=jax.ShapeDtypeStruct(shape, y.dtype),
        grid=(1,),
        in_specs=[spec] * 4,
        out_specs=spec,
    )(*quads)
    return out.reshape(C, B, H2, W2)


def _fc_fused_kernel(x_ref, w1_ref, b1_ref, w2_ref, b2_ref, w3_ref, b3_ref,
                     o_ref):
    # fc1 + SiLU + fc2 + SiLU + fc3, all in one kernel (weights all fit VMEM).
    h = jnp.dot(x_ref[...], w1_ref[...],
                preferred_element_type=jnp.float32) + b1_ref[...]
    h = h * jax.nn.sigmoid(h)
    h = jnp.dot(h.astype(w2_ref.dtype), w2_ref[...],
                preferred_element_type=jnp.float32) + b2_ref[...]
    h = h * jax.nn.sigmoid(h)
    h = jnp.dot(h.astype(w3_ref.dtype), w3_ref[...],
                preferred_element_type=jnp.float32) + b3_ref[...]
    o_ref[...] = h.astype(o_ref.dtype)


def fc_fused(x, w1, b1, w2, b2, w3, b3):
    """x: [B, 1024] -> logits [B, 10].  Batch padded only to a sublane multiple."""
    B, K = x.shape
    Bp = max(8, ((B + 7) // 8) * 8)
    xp = jnp.pad(x, ((0, Bp - B), (0, 0))) if Bp != B else x
    N3 = w3.shape[1]

    def full(shape):
        return pl.BlockSpec(shape, lambda i, _s=shape: (0,) * len(_s))

    out = pl.pallas_call(
        _fc_fused_kernel,
        out_shape=jax.ShapeDtypeStruct((Bp, N3), jnp.float32),
        grid=(1,),
        in_specs=[
            full((Bp, K)),
            full(w1.shape), full((1, w1.shape[1])),
            full(w2.shape), full((1, w2.shape[1])),
            full(w3.shape), full((1, w3.shape[1])),
        ],
        out_specs=full((Bp, N3)),
    )(
        xp.astype(jnp.bfloat16),
        w1.astype(jnp.bfloat16), b1.reshape(1, -1),
        w2.astype(jnp.bfloat16), b2.reshape(1, -1),
        w3.astype(jnp.bfloat16), b3.reshape(1, -1),
    )
    return out[:B]


# ----------------------------------------------------------------------------
# Glue (plain JAX): planar im2col patch extraction, param setup
# ----------------------------------------------------------------------------
def planar_patches(x, k, pad):
    """x: [Cin, B, H, W] -> P [Cin*k*k, B*H*W], rows ordered (cin, kh, kw) to
    match PyTorch's weight.reshape(Cout, Cin*k*k) flattening."""
    Cin, B, H, W = x.shape
    xp = jnp.pad(x, ((0, 0), (0, 0), (pad, pad), (pad, pad)))
    cols = []
    for dh in range(k):
        for dw in range(k):
            cols.append(xp[:, :, dh:dh + H, dw:dw + W])   # [Cin, B, H, W]
    p = jnp.stack(cols, axis=1)                            # [Cin, k*k, B, H, W]
    return p.reshape(Cin * k * k, B * H * W)
    # TODO(synk): the k*k shifted copies are still materialized host-side
    # (small here); a fully in-kernel shift-and-accumulate would remove them.


def conv2d_silu_planar(x, weight, bias, *, pad=2):
    """PyTorch Conv2d (stride 1, padding=2) + SiLU on planar activations.
    x: [Cin, B, H, W], weight: [Cout, Cin, k, k], bias: [Cout] -> [Cout, B, H, W]."""
    Cin, B, H, W = x.shape
    Cout, _, k, _ = weight.shape
    P = planar_patches(x, k, pad).astype(jnp.bfloat16)      # [Cin*k*k, B*H*W]
    Wg = weight.reshape(Cout, Cin * k * k).astype(jnp.bfloat16)
    y = conv_gemm_silu(Wg, P, bias)                          # [Cout, B*H*W] f32
    return y.reshape(Cout, B, H, W)


def init_params(key):
    """Deterministic synthetic params, PyTorch-default-style uniform init."""
    def uniform(k, shape, fan_in):
        bound = 1.0 / float(fan_in) ** 0.5
        return jax.random.uniform(k, shape, jnp.float32, -bound, bound)

    ks = jax.random.split(key, 10)
    return {
        "conv1_w": uniform(ks[0], (8, 3, 5, 5), 3 * 5 * 5),
        "conv1_b": uniform(ks[1], (8,), 3 * 5 * 5),
        "conv2_w": uniform(ks[2], (16, 8, 5, 5), 8 * 5 * 5),
        "conv2_b": uniform(ks[3], (16,), 8 * 5 * 5),
        "fc1_w": uniform(ks[4], (16 * 8 * 8, 120), 16 * 8 * 8),
        "fc1_b": uniform(ks[5], (120,), 16 * 8 * 8),
        "fc2_w": uniform(ks[6], (120, 56), 120),
        "fc2_b": uniform(ks[7], (56,), 120),
        "fc3_w": uniform(ks[8], (56, 10), 56),
        "fc3_b": uniform(ks[9], (10,), 56),
    }


def net_forward(params, x):
    # x: [B, 3, 32, 32] NCHW (32x32 input implied by the 16*8*8 flatten)
    B = x.shape[0]
    y = jnp.transpose(x, (1, 0, 2, 3))                            # planar [3, B, 32, 32]
    y = conv2d_silu_planar(y, params["conv1_w"], params["conv1_b"])   # [8, B, 32, 32]
    y = maxpool2x2_planar(y)                                          # [8, B, 16, 16]
    y = conv2d_silu_planar(y, params["conv2_w"], params["conv2_b"])   # [16, B, 16, 16]
    y = maxpool2x2_planar(y)                                          # [16, B, 8, 8]
    # Back to PyTorch .view(-1, 16*8*8) order: row b = (c, h, w) row-major.
    y = jnp.transpose(y, (1, 0, 2, 3)).reshape(B, 16 * 8 * 8)
    logits = fc_fused(y, params["fc1_w"], params["fc1_b"],
                      params["fc2_w"], params["fc2_b"],
                      params["fc3_w"], params["fc3_b"])
    return logits                                                     # [B, 10]


if __name__ == "__main__":
    key = jax.random.PRNGKey(0)
    k_params, k_x = jax.random.split(key)
    params = init_params(k_params)
    x = jax.random.normal(k_x, (2, 3, 32, 32), jnp.float32)

    logits = jax.jit(net_forward)(params, x)
    logits = jax.block_until_ready(logits)
    assert logits.shape == (2, 10) and logits.dtype == jnp.float32
    print("KERNEL_OK")
</pallas_src>

<mosaic_0001>
module attributes {stable_mosaic.version = 11 : i64} {
  func.func @_conv_gemm_silu_kernel(%arg0: i32, %arg1: memref<8x75xbf16, #tpu.memory_space<vmem>>, %arg2: memref<75x1024xbf16, #tpu.memory_space<vmem>>, %arg3: memref<8x1xf32, #tpu.memory_space<vmem>>, %arg4: memref<8x1024xf32, #tpu.memory_space<vmem>>) attributes {dimension_semantics = [#tpu.dimension_semantics<parallel>], iteration_bounds = array<i64: 2>, scalar_prefetch = 0 : i64, scratch_operands = 0 : i64, tpu.core_type = #tpu.core_type<tc>, window_params = [{pipeline_mode = #tpu.pipeline_mode<synchronous>, transform_indices = @transform_0, window_bounds = array<i64: 8, 75>}, {transform_indices = @transform_1, window_bounds = array<i64: 75, 1024>}, {pipeline_mode = #tpu.pipeline_mode<synchronous>, transform_indices = @transform_2, window_bounds = array<i64: 8, 1>}, {transform_indices = @transform_3, window_bounds = array<i64: 8, 1024>}]} {
    %c0 = arith.constant 0 : index
    %c0_0 = arith.constant 0 : index
    %0 = vector.load %arg1[%c0, %c0_0] : memref<8x75xbf16, #tpu.memory_space<vmem>>, vector<8x75xbf16>
    %c0_1 = arith.constant 0 : index
    %c0_2 = arith.constant 0 : index
    %1 = vector.load %arg2[%c0_1, %c0_2] : memref<75x1024xbf16, #tpu.memory_space<vmem>>, vector<75x1024xbf16>
    %cst = arith.constant dense<0.000000e+00> : vector<8x1024xf32>
    %2 = tpu.matmul %0, %1, %cst {dimension_numbers = #tpu.dot_dimension_numbers<[1], [0], [0], [1], [0, 0, 1, 1], [], []>} : vector<8x75xbf16>, vector<75x1024xbf16>, vector<8x1024xf32> -> vector<8x1024xf32>
    %c0_3 = arith.constant 0 : index
    %c0_4 = arith.constant 0 : index
    %3 = vector.load %arg3[%c0_3, %c0_4] : memref<8x1xf32, #tpu.memory_space<vmem>>, vector<8x1xf32>
    %4 = vector.broadcast %3 : vector<8x1xf32> to vector<8x1024xf32>
    %5 = arith.addf %2, %4 : vector<8x1024xf32>
    %6 = arith.negf %5 : vector<8x1024xf32>
    %7 = math.exp %6 : vector<8x1024xf32>
    %cst_5 = arith.constant 1.000000e+00 : f32
    %8 = vector.broadcast %cst_5 : f32 to vector<8x1024xf32>
    %9 = arith.addf %8, %7 : vector<8x1024xf32>
    %10 = arith.divf %8, %9 : vector<8x1024xf32>
    %11 = arith.mulf %5, %10 : vector<8x1024xf32>
    %c0_6 = arith.constant 0 : index
    %c0_7 = arith.constant 0 : index
    %12 = vector.load %arg4[%c0_6, %c0_7] : memref<8x1024xf32, #tpu.memory_space<vmem>>, vector<8x1024xf32>
    tpu.vector_store %arg4[%c0_6, %c0_7], %11 {strides = array<i32>} : memref<8x1024xf32, #tpu.memory_space<vmem>>, vector<8x1024xf32>,
    return
  }
  func.func @transform_0(%arg0: i32) -> (i32, i32) {
    %c0_i32 = arith.constant 0 : i32
    %c0_i32_0 = arith.constant 0 : i32
    %c0_i32_1 = arith.constant 0 : i32
    return %c0_i32, %c0_i32_0 : i32, i32
  }
  func.func @transform_1(%arg0: i32) -> (i32, i32) {
    %c0_i32 = arith.constant 0 : i32
    %c0_i32_0 = arith.constant 0 : i32
    return %c0_i32, %arg0 : i32, i32
  }
  func.func @transform_2(%arg0: i32) -> (i32, i32) {
    %c0_i32 = arith.constant 0 : i32
    %c0_i32_0 = arith.constant 0 : i32
    %c0_i32_1 = arith.constant 0 : i32
    return %c0_i32, %c0_i32_0 : i32, i32
  }
  func.func @transform_3(%arg0: i32) -> (i32, i32) {
    %c0_i32 = arith.constant 0 : i32
    %c0_i32_0 = arith.constant 0 : i32
    return %c0_i32, %arg0 : i32, i32
  }
}

module attributes {stable_mosaic.version = 11 : i64} {
  func.func @_max4_kernel(%arg0: i32, %arg1: memref<8x512xf32, #tpu.memory_space<vmem>>, %arg2: memref<8x512xf32, #tpu.memory_space<vmem>>, %arg3: memref<8x512xf32, #tpu.memory_space<vmem>>, %arg4: memref<8x512xf32, #tpu.memory_space<vmem>>, %arg5: memref<8x512xf32, #tpu.memory_space<vmem>>) attributes {dimension_semantics = [#tpu.dimension_semantics<arbitrary>], iteration_bounds = array<i64: 1>, scalar_prefetch = 0 : i64, scratch_operands = 0 : i64, tpu.core_type = #tpu.core_type<tc>, window_params = [{pipeline_mode = #tpu.pipeline_mode<synchronous>, transform_indices = @transform_0, window_bounds = array<i64: 8, 512>}, {pipeline_mode = #tpu.pipeline_mode<synchronous>, transform_indices = @transform_1, window_bounds = array<i64: 8, 512>}, {pipeline_mode = #tpu.pipeline_mode<synchronous>, transform_indices = @transform_2, window_bounds = array<i64: 8, 512>}, {pipeline_mode = #tpu.pipeline_mode<synchronous>, transform_indices = @transform_3, window_bounds = array<i64: 8, 512>}, {pipeline_mode = #tpu.pipeline_mode<synchronous>, transform_indices = @transform_4, window_bounds = array<i64: 8, 512>}]} {
    %c0 = arith.constant 0 : index
    %c0_0 = arith.constant 0 : index
    %0 = vector.load %arg1[%c0, %c0_0] : memref<8x512xf32, #tpu.memory_space<vmem>>, vector<8x512xf32>
    %c0_1 = arith.constant 0 : index
    %c0_2 = arith.constant 0 : index
    %1 = vector.load %arg2[%c0_1, %c0_2] : memref<8x512xf32, #tpu.memory_space<vmem>>, vector<8x512xf32>
    %2 = arith.maximumf %0, %1 : vector<8x512xf32>
    %c0_3 = arith.constant 0 : index
    %c0_4 = arith.constant 0 : index
    %3 = vector.load %arg3[%c0_3, %c0_4] : memref<8x512xf32, #tpu.memory_space<vmem>>, vector<8x512xf32>
    %c0_5 = arith.constant 0 : index
    %c0_6 = arith.constant 0 : index
    %4 = vector.load %arg4[%c0_5, %c0_6] : memref<8x512xf32, #tpu.memory_space<vmem>>, vector<8x512xf32>
    %5 = arith.maximumf %3, %4 : vector<8x512xf32>
    %6 = arith.maximumf %2, %5 : vector<8x512xf32>
    %c0_7 = arith.constant 0 : index
    %c0_8 = arith.constant 0 : index
    %7 = vector.load %arg5[%c0_7, %c0_8] : memref<8x512xf32, #tpu.memory_space<vmem>>, vector<8x512xf32>
    tpu.vector_store %arg5[%c0_7, %c0_8], %6 {strides = array<i32>} : memref<8x512xf32, #tpu.memory_space<vmem>>, vector<8x512xf32>,
    return
  }
  func.func @transform_0(%arg0: i32) -> (i32, i32) {
    %c0_i32 = arith.constant 0 : i32
    %c0_i32_0 = arith.constant 0 : i32
    %c0_i32_1 = arith.constant 0 : i32
    return %c0_i32, %c0_i32_0 : i32, i32
  }
  func.func @transform_1(%arg0: i32) -> (i32, i32) {
    %c0_i32 = arith.constant 0 : i32
    %c0_i32_0 = arith.constant 0 : i32
    %c0_i32_1 = arith.constant 0 : i32
    return %c0_i32, %c0_i32_0 : i32, i32
  }
  func.func @transform_2(%arg0: i32) -> (i32, i32) {
    %c0_i32 = arith.constant 0 : i32
    %c0_i32_0 = arith.constant 0 : i32
    %c0_i32_1 = arith.constant 0 : i32
    return %c0_i32, %c0_i32_0 : i32, i32
  }
  func.func @transform_3(%arg0: i32) -> (i32, i32) {
    %c0_i32 = arith.constant 0 : i32
    %c0_i32_0 = arith.constant 0 : i32
    %c0_i32_1 = arith.constant 0 : i32
    return %c0_i32, %c0_i32_0 : i32, i32
  }
  func.func @transform_4(%arg0: i32) -> (i32, i32) {
    %c0_i32 = arith.constant 0 : i32
    %c0_i32_0 = arith.constant 0 : i32
    %c0_i32_1 = arith.constant 0 : i32
    return %c0_i32, %c0_i32_0 : i32, i32
  }
}

module attributes {stable_mosaic.version = 11 : i64} {
  func.func @_conv_gemm_silu_kernel(%arg0: i32, %arg1: memref<16x200xbf16, #tpu.memory_space<vmem>>, %arg2: memref<200x256xbf16, #tpu.memory_space<vmem>>, %arg3: memref<16x1xf32, #tpu.memory_space<vmem>>, %arg4: memref<16x256xf32, #tpu.memory_space<vmem>>) attributes {dimension_semantics = [#tpu.dimension_semantics<parallel>], iteration_bounds = array<i64: 2>, scalar_prefetch = 0 : i64, scratch_operands = 0 : i64, tpu.core_type = #tpu.core_type<tc>, window_params = [{pipeline_mode = #tpu.pipeline_mode<synchronous>, transform_indices = @transform_0, window_bounds = array<i64: 16, 200>}, {transform_indices = @transform_1, window_bounds = array<i64: 200, 256>}, {pipeline_mode = #tpu.pipeline_mode<synchronous>, transform_indices = @transform_2, window_bounds = array<i64: 16, 1>}, {transform_indices = @transform_3, window_bounds = array<i64: 16, 256>}]} {
    %c0 = arith.constant 0 : index
    %c0_0 = arith.constant 0 : index
    %0 = vector.load %arg1[%c0, %c0_0] : memref<16x200xbf16, #tpu.memory_space<vmem>>, vector<16x200xbf16>
    %c0_1 = arith.constant 0 : index
    %c0_2 = arith.constant 0 : index
    %1 = vector.load %arg2[%c0_1, %c0_2] : memref<200x256xbf16, #tpu.memory_space<vmem>>, vector<200x256xbf16>
    %cst = arith.constant dense<0.000000e+00> : vector<16x256xf32>
    %2 = tpu.matmul %0, %1, %cst {dimension_numbers = #tpu.dot_dimension_numbers<[1], [0], [0], [1], [0, 0, 1, 1], [], []>} : vector<16x200xbf16>, vector<200x256xbf16>, vector<16x256xf32> -> vector<16x256xf32>
    %c0_3 = arith.constant 0 : index
    %c0_4 = arith.constant 0 : index
    %3 = vector.load %arg3[%c0_3, %c0_4] : memref<16x1xf32, #tpu.memory_space<vmem>>, vector<16x1xf32>
    %4 = vector.broadcast %3 : vector<16x1xf32> to vector<16x256xf32>
    %5 = arith.addf %2, %4 : vector<16x256xf32>
    %6 = arith.negf %5 : vector<16x256xf32>
    %7 = math.exp %6 : vector<16x256xf32>
    %cst_5 = arith.constant 1.000000e+00 : f32
    %8 = vector.broadcast %cst_5 : f32 to vector<16x256xf32>
    %9 = arith.addf %8, %7 : vector<16x256xf32>
    %10 = arith.divf %8, %9 : vector<16x256xf32>
    %11 = arith.mulf %5, %10 : vector<16x256xf32>
    %c0_6 = arith.constant 0 : index
    %c0_7 = arith.constant 0 : index
    %12 = vector.load %arg4[%c0_6, %c0_7] : memref<16x256xf32, #tpu.memory_space<vmem>>, vector<16x256xf32>
    tpu.vector_store %arg4[%c0_6, %c0_7], %11 {strides = array<i32>} : memref<16x256xf32, #tpu.memory_space<vmem>>, vector<16x256xf32>,
    return
  }
  func.func @transform_0(%arg0: i32) -> (i32, i32) {
    %c0_i32 = arith.constant 0 : i32
    %c0_i32_0 = arith.constant 0 : i32
    %c0_i32_1 = arith.constant 0 : i32
    return %c0_i32, %c0_i32_0 : i32, i32
  }
  func.func @transform_1(%arg0: i32) -> (i32, i32) {
    %c0_i32 = arith.constant 0 : i32
    %c0_i32_0 = arith.constant 0 : i32
    return %c0_i32, %arg0 : i32, i32
  }
  func.func @transform_2(%arg0: i32) -> (i32, i32) {
    %c0_i32 = arith.constant 0 : i32
    %c0_i32_0 = arith.constant 0 : i32
    %c0_i32_1 = arith.constant 0 : i32
    return %c0_i32, %c0_i32_0 : i32, i32
  }
  func.func @transform_3(%arg0: i32) -> (i32, i32) {
    %c0_i32 = arith.constant 0 : i32
    %c0_i32_0 = arith.constant 0 : i32
    return %c0_i32, %arg0 : i32, i32
  }
}

module attributes {stable_mosaic.version = 11 : i64} {
  func.func @_max4_kernel(%arg0: i32, %arg1: memref<16x128xf32, #tpu.memory_space<vmem>>, %arg2: memref<16x128xf32, #tpu.memory_space<vmem>>, %arg3: memref<16x128xf32, #tpu.memory_space<vmem>>, %arg4: memref<16x128xf32, #tpu.memory_space<vmem>>, %arg5: memref<16x128xf32, #tpu.memory_space<vmem>>) attributes {dimension_semantics = [#tpu.dimension_semantics<arbitrary>], iteration_bounds = array<i64: 1>, scalar_prefetch = 0 : i64, scratch_operands = 0 : i64, tpu.core_type = #tpu.core_type<tc>, window_params = [{pipeline_mode = #tpu.pipeline_mode<synchronous>, transform_indices = @transform_0, window_bounds = array<i64: 16, 128>}, {pipeline_mode = #tpu.pipeline_mode<synchronous>, transform_indices = @transform_1, window_bounds = array<i64: 16, 128>}, {pipeline_mode = #tpu.pipeline_mode<synchronous>, transform_indices = @transform_2, window_bounds = array<i64: 16, 128>}, {pipeline_mode = #tpu.pipeline_mode<synchronous>, transform_indices = @transform_3, window_bounds = array<i64: 16, 128>}, {pipeline_mode = #tpu.pipeline_mode<synchronous>, transform_indices = @transform_4, window_bounds = array<i64: 16, 128>}]} {
    %c0 = arith.constant 0 : index
    %c0_0 = arith.constant 0 : index
    %0 = vector.load %arg1[%c0, %c0_0] : memref<16x128xf32, #tpu.memory_space<vmem>>, vector<16x128xf32>
    %c0_1 = arith.constant 0 : index
    %c0_2 = arith.constant 0 : index
    %1 = vector.load %arg2[%c0_1, %c0_2] : memref<16x128xf32, #tpu.memory_space<vmem>>, vector<16x128xf32>
    %2 = arith.maximumf %0, %1 : vector<16x128xf32>
    %c0_3 = arith.constant 0 : index
    %c0_4 = arith.constant 0 : index
    %3 = vector.load %arg3[%c0_3, %c0_4] : memref<16x128xf32, #tpu.memory_space<vmem>>, vector<16x128xf32>
    %c0_5 = arith.constant 0 : index
    %c0_6 = arith.constant 0 : index
    %4 = vector.load %arg4[%c0_5, %c0_6] : memref<16x128xf32, #tpu.memory_space<vmem>>, vector<16x128xf32>
    %5 = arith.maximumf %3, %4 : vector<16x128xf32>
    %6 = arith.maximumf %2, %5 : vector<16x128xf32>
    %c0_7 = arith.constant 0 : index
    %c0_8 = arith.constant 0 : index
    %7 = vector.load %arg5[%c0_7, %c0_8] : memref<16x128xf32, #tpu.memory_space<vmem>>, vector<16x128xf32>
    tpu.vector_store %arg5[%c0_7, %c0_8], %6 {strides = array<i32>} : memref<16x128xf32, #tpu.memory_space<vmem>>, vector<16x128xf32>,
    return
  }
  func.func @transform_0(%arg0: i32) -> (i32, i32) {
    %c0_i32 = arith.constant 0 : i32
    %c0_i32_0 = arith.constant 0 : i32
    %c0_i32_1 = arith.constant 0 : i32
    return %c0_i32, %c0_i32_0 : i32, i32
  }
  func.func @transform_1(%arg0: i32) -> (i32, i32) {
    %c0_i32 = arith.constant 0 : i32
    %c0_i32_0 = arith.constant 0 : i32
    %c0_i32_1 = arith.constant 0 : i32
    return %c0_i32, %c0_i32_0 : i32, i32
  }
  func.func @transform_2(%arg0: i32) -> (i32, i32) {
    %c0_i32 = arith.constant 0 : i32
    %c0_i32_0 = arith.constant 0 : i32
    %c0_i32_1 = arith.constant 0 : i32
    return %c0_i32, %c0_i32_0 : i32, i32
  }
  func.func @transform_3(%arg0: i32) -> (i32, i32) {
    %c0_i32 = arith.constant 0 : i32
    %c0_i32_0 = arith.constant 0 : i32
    %c0_i32_1 = arith.constant 0 : i32
    return %c0_i32, %c0_i32_0 : i32, i32
  }
  func.func @transform_4(%arg0: i32) -> (i32, i32) {
    %c0_i32 = arith.constant 0 : i32
    %c0_i32_0 = arith.constant 0 : i32
    %c0_i32_1 = arith.constant 0 : i32
    return %c0_i32, %c0_i32_0 : i32, i32
  }
}

module attributes {stable_mosaic.version = 11 : i64} {
  func.func @_fc_fused_kernel(%arg0: i32, %arg1: memref<8x1024xbf16, #tpu.memory_space<vmem>>, %arg2: memref<1024x120xbf16, #tpu.memory_space<vmem>>, %arg3: memref<1x120xf32, #tpu.memory_space<vmem>>, %arg4: memref<120x56xbf16, #tpu.memory_space<vmem>>, %arg5: memref<1x56xf32, #tpu.memory_space<vmem>>, %arg6: memref<56x10xbf16, #tpu.memory_space<vmem>>, %arg7: memref<1x10xf32, #tpu.memory_space<vmem>>, %arg8: memref<8x10xf32, #tpu.memory_space<vmem>>) attributes {dimension_semantics = [#tpu.dimension_semantics<arbitrary>], iteration_bounds = array<i64: 1>, scalar_prefetch = 0 : i64, scratch_operands = 0 : i64, tpu.core_type = #tpu.core_type<tc>, window_params = [{pipeline_mode = #tpu.pipeline_mode<synchronous>, transform_indices = @transform_0, window_bounds = array<i64: 8, 1024>}, {pipeline_mode = #tpu.pipeline_mode<synchronous>, transform_indices = @transform_1, window_bounds = array<i64: 1024, 120>}, {pipeline_mode = #tpu.pipeline_mode<synchronous>, transform_indices = @transform_2, window_bounds = array<i64: 1, 120>}, {pipeline_mode = #tpu.pipeline_mode<synchronous>, transform_indices = @transform_3, window_bounds = array<i64: 120, 56>}, {pipeline_mode = #tpu.pipeline_mode<synchronous>, transform_indices = @transform_4, window_bounds = array<i64: 1, 56>}, {pipeline_mode = #tpu.pipeline_mode<synchronous>, transform_indices = @transform_5, window_bounds = array<i64: 56, 10>}, {pipeline_mode = #tpu.pipeline_mode<synchronous>, transform_indices = @transform_6, window_bounds = array<i64: 1, 10>}, {pipeline_mode = #tpu.pipeline_mode<synchronous>, transform_indices = @transform_7, window_bounds = array<i64: 8, 10>}]} {
    %c0 = arith.constant 0 : index
    %c0_0 = arith.constant 0 : index
    %0 = vector.load %arg1[%c0, %c0_0] : memref<8x1024xbf16, #tpu.memory_space<vmem>>, vector<8x1024xbf16>
    %c0_1 = arith.constant 0 : index
    %c0_2 = arith.constant 0 : index
    %1 = vector.load %arg2[%c0_1, %c0_2] : memref<1024x120xbf16, #tpu.memory_space<vmem>>, vector<1024x120xbf16>
    %cst = arith.constant dense<0.000000e+00> : vector<8x120xf32>
    %2 = tpu.matmul %0, %1, %cst {dimension_numbers = #tpu.dot_dimension_numbers<[1], [0], [0], [1], [0, 0, 1, 1], [], []>} : vector<8x1024xbf16>, vector<1024x120xbf16>, vector<8x120xf32> -> vector<8x120xf32>
    %c0_3 = arith.constant 0 : index
    %c0_4 = arith.constant 0 : index
    %3 = vector.load %arg3[%c0_3, %c0_4] : memref<1x120xf32, #tpu.memory_space<vmem>>, vector<1x120xf32>
    %4 = vector.broadcast %3 : vector<1x120xf32> to vector<8x120xf32>
    %5 = arith.addf %2, %4 : vector<8x120xf32>
    %6 = arith.negf %5 : vector<8x120xf32>
    %7 = math.exp %6 : vector<8x120xf32>
    %cst_5 = arith.constant 1.000000e+00 : f32
    %8 = vector.broadcast %cst_5 : f32 to vector<8x120xf32>
    %9 = arith.addf %8, %7 : vector<8x120xf32>
    %10 = arith.divf %8, %9 : vector<8x120xf32>
    %11 = arith.mulf %5, %10 : vector<8x120xf32>
    %12 = arith.truncf %11 : vector<8x120xf32> to vector<8x120xbf16>
    %c0_6 = arith.constant 0 : index
    %c0_7 = arith.constant 0 : index
    %13 = vector.load %arg4[%c0_6, %c0_7] : memref<120x56xbf16, #tpu.memory_space<vmem>>, vector<120x56xbf16>
    %cst_8 = arith.constant dense<0.000000e+00> : vector<8x56xf32>
    %14 = tpu.matmul %12, %13, %cst_8 {dimension_numbers = #tpu.dot_dimension_numbers<[1], [0], [0], [1], [0, 0, 1, 1], [], []>} : vector<8x120xbf16>, vector<120x56xbf16>, vector<8x56xf32> -> vector<8x56xf32>
    %c0_9 = arith.constant 0 : index
    %c0_10 = arith.constant 0 : index
    %15 = vector.load %arg5[%c0_9, %c0_10] : memref<1x56xf32, #tpu.memory_space<vmem>>, vector<1x56xf32>
    %16 = vector.broadcast %15 : vector<1x56xf32> to vector<8x56xf32>
    %17 = arith.addf %14, %16 : vector<8x56xf32>
    %18 = arith.negf %17 : vector<8x56xf32>
    %19 = math.exp %18 : vector<8x56xf32>
    %cst_11 = arith.constant 1.000000e+00 : f32
    %20 = vector.broadcast %cst_11 : f32 to vector<8x56xf32>
    %21 = arith.addf %20, %19 : vector<8x56xf32>
    %22 = arith.divf %20, %21 : vector<8x56xf32>
    %23 = arith.mulf %17, %22 : vector<8x56xf32>
    %24 = arith.truncf %23 : vector<8x56xf32> to vector<8x56xbf16>
    %c0_12 = arith.constant 0 : index
    %c0_13 = arith.constant 0 : index
    %25 = vector.load %arg6[%c0_12, %c0_13] : memref<56x10xbf16, #tpu.memory_space<vmem>>, vector<56x10xbf16>
    %cst_14 = arith.constant dense<0.000000e+00> : vector<8x10xf32>
    %26 = tpu.matmul %24, %25, %cst_14 {dimension_numbers = #tpu.dot_dimension_numbers<[1], [0], [0], [1], [0, 0, 1, 1], [], []>} : vector<8x56xbf16>, vector<56x10xbf16>, vector<8x10xf32> -> vector<8x10xf32>
    %c0_15 = arith.constant 0 : index
    %c0_16 = arith.constant 0 : index
    %27 = vector.load %arg7[%c0_15, %c0_16] : memref<1x10xf32, #tpu.memory_space<vmem>>, vector<1x10xf32>
    %28 = vector.broadcast %27 : vector<1x10xf32> to vector<8x10xf32>
    %29 = arith.addf %26, %28 : vector<8x10xf32>
    %c0_17 = arith.constant 0 : index
    %c0_18 = arith.constant 0 : index
    %30 = vector.load %arg8[%c0_17, %c0_18] : memref<8x10xf32, #tpu.memory_space<vmem>>, vector<8x10xf32>
    tpu.vector_store %arg8[%c0_17, %c0_18], %29 {strides = array<i32>} : memref<8x10xf32, #tpu.memory_space<vmem>>, vector<8x10xf32>,
    return
  }
  func.func @transform_0(%arg0: i32) -> (i32, i32) {
    %c0_i32 = arith.constant 0 : i32
    %c0_i32_0 = arith.constant 0 : i32
    %c0_i32_1 = arith.constant 0 : i32
    return %c0_i32, %c0_i32_0 : i32, i32
  }
  func.func @transform_1(%arg0: i32) -> (i32, i32) {
    %c0_i32 = arith.constant 0 : i32
    %c0_i32_0 = arith.constant 0 : i32
    %c0_i32_1 = arith.constant 0 : i32
    return %c0_i32, %c0_i32_0 : i32, i32
  }
  func.func @transform_2(%arg0: i32) -> (i32, i32) {
    %c0_i32 = arith.constant 0 : i32
    %c0_i32_0 = arith.constant 0 : i32
    %c0_i32_1 = arith.constant 0 : i32
    return %c0_i32, %c0_i32_0 : i32, i32
  }
  func.func @transform_3(%arg0: i32) -> (i32, i32) {
    %c0_i32 = arith.constant 0 : i32
    %c0_i32_0 = arith.constant 0 : i32
    %c0_i32_1 = arith.constant 0 : i32
    return %c0_i32, %c0_i32_0 : i32, i32
  }
  func.func @transform_4(%arg0: i32) -> (i32, i32) {
    %c0_i32 = arith.constant 0 : i32
    %c0_i32_0 = arith.constant 0 : i32
    %c0_i32_1 = arith.constant 0 : i32
    return %c0_i32, %c0_i32_0 : i32, i32
  }
  func.func @transform_5(%arg0: i32) -> (i32, i32) {
    %c0_i32 = arith.constant 0 : i32
    %c0_i32_0 = arith.constant 0 : i32
    %c0_i32_1 = arith.constant 0 : i32
    return %c0_i32, %c0_i32_0 : i32, i32
  }
  func.func @transform_6(%arg0: i32) -> (i32, i32) {
    %c0_i32 = arith.constant 0 : i32
    %c0_i32_0 = arith.constant 0 : i32
    %c0_i32_1 = arith.constant 0 : i32
    return %c0_i32, %c0_i32_0 : i32, i32
  }
  func.func @transform_7(%arg0: i32) -> (i32, i32) {
    %c0_i32 = arith.constant 0 : i32
    %c0_i32_0 = arith.constant 0 : i32
    %c0_i32_1 = arith.constant 0 : i32
    return %c0_i32, %c0_i32_0 : i32, i32
  }
}

</mosaic_0001>

<bundles_post_ra>
// kernel: net_forward.5
= control target key start
LH: loop header
LB: loop body
LE: loop exit
PB: predicated region body
PF: predicated region fallthrough
CT: control target
= control target key end

     0   :  { %s1004_s12 = smov 0   ;;  %s1006_s13 = smov 0   ;;  %s1217_s0 = inlined_call_operand.vmem [shape: bf16[8,75], index: 0, kind: input, shape index: {}]   ;;  %s1218_s1 = inlined_call_operand.vmem [shape: bf16[75,2048], index: 1, kind: input, shape index: {}]   ;;  %s1219_s2 = inlined_call_operand.vmem [shape: f32[8,1], index: 2, kind: input, shape index: {}]   ;;  %s1220_s3 = inlined_call_operand.vmem [shape: f32[8,2048], index: 3, kind: output, shape index: {}]  }
   0x1   :  { %s1008_s14 = smov 0  }
   0x2 LB: > { %s833_s15 = sadd.s32 4294967295, %s980_s14   ;;  %s1021_s16 = sadd.s32 1, %s980_s14   ;;  %s980_s14 = sphi %s1008_s14, %s1223_s14   ;;  %s976_s13 = sphi %s1006_s13, %s1222_s13   ;;  %s972_s12 = sphi %s1004_s12, %s1221_s12  }
   0x3   : > { %s38_s17 = ssub.s32 %s980_s14, %s1021_s16  ;;  %s41_s18 = sadd.s32 1, %s976_s13 }
   0x4   : > { %p39_p0 = scmp.eq.s32.totalorder %s38_s17, 0  ;;  %p48_p1 = scmp.ne.s32.totalorder %s976_s13, %s972_s12 }
   0x5   : > { %p49_p2 = scmp.eq.s32.totalorder %s980_s14, 0  ;;  %p836_p4 = scmp.ge.s32.totalorder %s980_s14, 2 }
   0x6   : > { %s1030_s19 = scalar_select %p39_p0, %s976_s13, %s41_s18  }
   0x7   : > { %p50_p3 = por %p49_p2, %p48_p1  ;;  %127 = sbr.rel (%p836_p4) target bundleno = 39 (0x27), region = 24 }
   0xe   : > { %130 = sbr.rel (!%p50_p3) target bundleno = 39 (0x27), region = 28  ;;  %s132_s20 = sand.u32 (%p50_p3), 1, %s976_s13  }
   0xf   : > { %s896_s21 = sshll.u32 (%p50_p3), %s980_s14, 5  ;;  %s897_s22 = smul.u32 (%p50_p3), 320, %s132_s20 }
  0x10   : > { %s1038_s25 = scalar_lea.vmem (%p50_p3), %s1218_s1, %s896_s21 }
  0x11   : > { %v150_v0 = vld [vmem:[%s1038_s25] sm:$0xff] (%p50_p3)  ;;  %v152_v1 = vld [vmem:[%s1038_s25 + $0x8] sm:$0xff] (%p50_p3)  ;;  %v154_v2 = vld [vmem:[%s1038_s25 + $0x10] sm:$0xff] (%p50_p3)  ;;  %s1046_s26 = scalar_lea.vmem (%p50_p3), [#allocation2], %s897_s22 }
  0x12   : > { %v156_v3 = vld [vmem:[%s1038_s25 + $0x18] sm:$0xff] (%p50_p3)  ;;  %v158_v4 = vld [vmem:[%s1038_s25 + $0x40] sm:$0xff] (%p50_p3)  ;;  %v160_v5 = vld [vmem:[%s1038_s25 + $0x48] sm:$0xff] (%p50_p3)  ;;  %151 = vst [vmem:[%s1046_s26] sm:$0xff] (%p50_p3), %v150_v0 }
  0x13   : > { %153 = vst [vmem:[%s1046_s26 + $0x8] sm:$0xff] (%p50_p3), %v152_v1  ;;  %155 = vst [vmem:[%s1046_s26 + $0x10] sm:$0xff] (%p50_p3), %v154_v2  ;;  %v162_v6 = vld [vmem:[%s1038_s25 + $0x50] sm:$0xff] (%p50_p3)  ;;  %v164_v7 = vld [vmem:[%s1038_s25 + $0x58] sm:$0xff] (%p50_p3) }
  0x14   : > { %157 = vst [vmem:[%s1046_s26 + $0x18] sm:$0xff] (%p50_p3), %v156_v3  ;;  %159 = vst [vmem:[%s1046_s26 + $0x20] sm:$0xff] (%p50_p3), %v158_v4  ;;  %v166_v8 = vld [vmem:[%s1038_s25 + $0x80] sm:$0xff] (%p50_p3)  ;;  %v168_v9 = vld [vmem:[%s1038_s25 + $0x88] sm:$0xff] (%p50_p3) }
  0x15   : > { %161 = vst [vmem:[%s1046_s26 + $0x28] sm:$0xff] %v160_v5  ;;  %163 = vst [vmem:[%s1046_s26 + $0x30] sm:$0xff] %v162_v6  ;;  %v170_v10 = vld [vmem:[%s1038_s25 + $0x90] sm:$0xff]  ;;  %v172_v11 = vld [vmem:[%s1038_s25 + $0x98] sm:$0xff] }
  0x16   : > { %165 = vst [vmem:[%s1046_s26 + $0x38] sm:$0xff] %v164_v7  ;;  %167 = vst [vmem:[%s1046_s26 + $0x40] sm:$0xff] %v166_v8  ;;  %v174_v12 = vld [vmem:[%s1038_s25 + $0xc0] sm:$0xff]  ;;  %v176_v13 = vld [vmem:[%s1038_s25 + $0xc8] sm:$0xff] }
  0x17   : > { %169 = vst [vmem:[%s1046_s26 + $0x48] sm:$0xff] %v168_v9  ;;  %171 = vst [vmem:[%s1046_s26 + $0x50] sm:$0xff] %v170_v10  ;;  %v178_v14 = vld [vmem:[%s1038_s25 + $0xd0] sm:$0xff]  ;;  %v180_v15 = vld [vmem:[%s1038_s25 + $0xd8] sm:$0xff] }
  0x18   : > { %173 = vst [vmem:[%s1046_s26 + $0x58] sm:$0xff] %v172_v11  ;;  %175 = vst [vmem:[%s1046_s26 + $0x60] sm:$0xff] %v174_v12  ;;  %v182_v16 = vld [vmem:[%s1038_s25 + $0x100] sm:$0xff]  ;;  %v184_v17 = vld [vmem:[%s1038_s25 + $0x108] sm:$0xff] }
  0x19   : > { %177 = vst [vmem:[%s1046_s26 + $0x68] sm:$0xff] %v176_v13  ;;  %179 = vst [vmem:[%s1046_s26 + $0x70] sm:$0xff] %v178_v14  ;;  %v186_v18 = vld [vmem:[%s1038_s25 + $0x110] sm:$0xff]  ;;  %v188_v19 = vld [vmem:[%s1038_s25 + $0x118] sm:$0xff] }
  0x1a   : > { %181 = vst [vmem:[%s1046_s26 + $0x78] sm:$0xff] %v180_v15  ;;  %183 = vst [vmem:[%s1046_s26 + $0x80] sm:$0xff] %v182_v16  ;;  %v190_v20 = vld [vmem:[%s1038_s25 + $0x140] sm:$0xff]  ;;  %v192_v21 = vld [vmem:[%s1038_s25 + $0x148] sm:$0xff] }
  0x1b   : > { %185 = vst [vmem:[%s1046_s26 + $0x88] sm:$0xff] %v184_v17  ;;  %187 = vst [vmem:[%s1046_s26 + $0x90] sm:$0xff] %v186_v18  ;;  %v194_v22 = vld [vmem:[%s1038_s25 + $0x150] sm:$0xff]  ;;  %v196_v23 = vld [vmem:[%s1038_s25 + $0x158] sm:$0xff] }
  0x1c   : > { %189 = vst [vmem:[%s1046_s26 + $0x98] sm:$0xff] %v188_v19  ;;  %191 = vst [vmem:[%s1046_s26 + $0xa0] sm:$0xff] %v190_v20  ;;  %v198_v24 = vld [vmem:[%s1038_s25 + $0x180] sm:$0xff]  ;;  %v200_v25 = vld [vmem:[%s1038_s25 + $0x188] sm:$0xff] }
  0x1d   : > { %193 = vst [vmem:[%s1046_s26 + $0xa8] sm:$0xff] %v192_v21  ;;  %195 = vst [vmem:[%s1046_s26 + $0xb0] sm:$0xff] %v194_v22  ;;  %v202_v26 = vld [vmem:[%s1038_s25 + $0x190] sm:$0xff]  ;;  %v204_v27 = vld [vmem:[%s1038_s25 + $0x198] sm:$0xff] }
  0x1e   : > { %197 = vst [vmem:[%s1046_s26 + $0xb8] sm:$0xff] %v196_v23  ;;  %199 = vst [vmem:[%s1046_s26 + $0xc0] sm:$0xff] %v198_v24  ;;  %v206_v28 = vld [vmem:[%s1038_s25 + $0x1c0] sm:$0xff]  ;;  %v208_v29 = vld [vmem:[%s1038_s25 + $0x1c8] sm:$0xff] }
  0x1f   : > { %201 = vst [vmem:[%s1046_s26 + $0xc8] sm:$0xff] %v200_v25  ;;  %203 = vst [vmem:[%s1046_s26 + $0xd0] sm:$0xff] %v202_v26  ;;  %v210_v30 = vld [vmem:[%s1038_s25 + $0x1d0] sm:$0xff]  ;;  %v212_v31 = vld [vmem:[%s1038_s25 + $0x1d8] sm:$0xff] }
  0x20   : > { %205 = vst [vmem:[%s1046_s26 + $0xd8] sm:$0xff] %v204_v27  ;;  %207 = vst [vmem:[%s1046_s26 + $0xe0] sm:$0xff] %v206_v28  ;;  %v214_v32 = vld [vmem:[%s1038_s25 + $0x200] sm:$0xff]  ;;  %v216_v33 = vld [vmem:[%s1038_s25 + $0x208] sm:$0xff] }
  0x21   : > { %209 = vst [vmem:[%s1046_s26 + $0xe8] sm:$0xff] %v208_v29  ;;  %211 = vst [vmem:[%s1046_s26 + $0xf0] sm:$0xff] %v210_v30  ;;  %v218_v34 = vld [vmem:[%s1038_s25 + $0x210] sm:$0xff]  ;;  %v220_v35 = vld [vmem:[%s1038_s25 + $0x218] sm:$0xff] }
  0x22   : > { %213 = vst [vmem:[%s1046_s26 + $0xf8] sm:$0xff] %v212_v31  ;;  %215 = vst [vmem:[%s1046_s26 + $0x100] sm:$0xff] %v214_v32  ;;  %v222_v36 = vld [vmem:[%s1038_s25 + $0x240] sm:$0xff]  ;;  %v224_v37 = vld [vmem:[%s1038_s25 + $0x248] sm:$0xff] }
  0x23   : > { %217 = vst [vmem:[%s1046_s26 + $0x108] sm:$0xff] %v216_v33  ;;  %219 = vst [vmem:[%s1046_s26 + $0x110] sm:$0xff] %v218_v34  ;;  %v226_v38 = vld [vmem:[%s1038_s25 + $0x250] sm:$0xff]  ;;  %v228_v39 = vld [vmem:[%s1038_s25 + $0x258] sm:$0xff] }
  0x24   : > { %221 = vst [vmem:[%s1046_s26 + $0x118] sm:$0xff] %v220_v35  ;;  %223 = vst [vmem:[%s1046_s26 + $0x120] sm:$0xff] %v222_v36 }
  0x25   : > { %225 = vst [vmem:[%s1046_s26 + $0x128] sm:$0xff] %v224_v37  ;;  %227 = vst [vmem:[%s1046_s26 + $0x130] sm:$0xff] %v226_v38 }
  0x26   : > { %229 = vst [vmem:[%s1046_s26 + $0x138] sm:$0xff] %v228_v39 }
  0x27 PF: > { %p839_p5 = scmp.ge.s32.totalorder %s980_s14, 1  ;;  %p234_p6 = scmp.lt.s32.totalorder %s980_s14, 3 }
  0x29   : > { %p235_p7 = pnand %p839_p5, %p234_p6 }
  0x2a   : > { %s241_s27 = sand.u32 (!%p235_p7), 1, %s972_s12   ;;  %v313_v40 = vld [vmem:[%s1219_s2] sm:$0xff] (!%p235_p7)  ;;  %v982_v41 = vmov (!%p235_p7), 0   ;;  %vm515_vm0 = vcmask (!%p235_p7), 1044480   ;;  %vm516_vm1 = vcmask (!%p235_p7), 1045504   ;;  %v983_v6 = vmov (!%p235_p7), 65535  }
  0x2b   : > { %238 = sbr.rel (%p235_p7) target bundleno = 337 (0x151), region = 51  ;;  %575 = vmatprep.mubr.bf16.mxu0 (!%p235_p7), %v982_v41  ;;  %616 = vmatprep.mubr.bf16.mxu1 (!%p235_p7), %v982_v41  ;;  %v517_v7 = vsel (!%p235_p7), %vm515_vm0, 4294967295, %v983_v6  ;;  %v272_v35 = vld [vmem:[%s1217_s0] sm:$0xf] (!%p235_p7)  ;;  %vm511_vm2 = vcmask (!%p235_p7), 613376   ;;  %s840_s7 = sshll.u32 (!%p235_p7), %s833_s15, 3 }
  0x2c   : > { %s898_s30 = smul.u32 (!%p235_p7), 320, %s241_s27  ;;  %925 = vset.pattern.permute.xlu0 (!%p235_p7), %v982_v41  ;;  %v1153_v15 = vsel (!%p235_p7), %vm516_vm1, %v517_v7, 0  ;;  %p266_p8 = scmp.lt.s32.totalorder (!%p235_p7), %s840_s7, 15 }
  0x2d   : > { %316 = vperm.xlu0 (!%p235_p7), %925, %v313_v40  }
  0x2e   : > { %s1131_s4 = scalar_lea.vmem (!%p235_p7), [#allocation2], %s898_s30 }
  0x2f   : > { %v273_v42 = vld [vmem:[%s1131_s4] sm:$0xff] (!%p235_p7)  ;;  %v274_v44 = vld [vmem:[%s1131_s4 + $0x8] sm:$0xff] (!%p235_p7)  ;;  %v275_v23 = vld [vmem:[%s1131_s4 + $0x10] sm:$0xff] (!%p235_p7) }
  0x30   : > { %v277_v43 = vld [vmem:[%s1131_s4 + $0x20] sm:$0xff] (!%p235_p7)  ;;  %v278_v46 = vld [vmem:[%s1131_s4 + $0x28] sm:$0xff] (!%p235_p7)  ;;  %v279_v24 = vld [vmem:[%s1131_s4 + $0x30] sm:$0xff] (!%p235_p7) }
  0x31   : > { %v843_v45 = vcombine.high (!%p235_p7), %v273_v42, %v277_v43  ;;  %v842_v47 = vcombine.low (!%p235_p7), %v273_v42, %v277_v43  ;;  %v281_v48 = vld [vmem:[%s1131_s4 + $0x40] sm:$0xff] (!%p235_p7)  ;;  %v845_v50 = vcombine.high (!%p235_p7), %v274_v44, %v278_v46  ;;  %v844_v51 = vcombine.low (!%p235_p7), %v274_v44, %v278_v46  ;;  %v282_v53 = vld [vmem:[%s1131_s4 + $0x48] sm:$0xff] (!%p235_p7)  ;;  %v276_v25 = vld [vmem:[%s1131_s4 + $0x18] sm:$0xff] (!%p235_p7) }
  0x32   : > { %v285_v49 = vld [vmem:[%s1131_s4 + $0x60] sm:$0xff]  ;;  %v286_v54 = vld [vmem:[%s1131_s4 + $0x68] sm:$0xff]  ;;  %v280_v26 = vld [vmem:[%s1131_s4 + $0x38] sm:$0xff]  ;;  %v847_v29 = vcombine.high %v275_v23, %v279_v24  ;;  %v846_v36 = vcombine.low %v275_v23, %v279_v24  ;;  %s1225_s7 = smov (!%p266_p8, %s840_s7), 15 }
  0x33   : > { %v851_v52 = vcombine.high %v281_v48, %v285_v49  ;;  %v289_v55 = vld [vmem:[%s1131_s4 + $0x80] sm:$0xff]  ;;  %543 = vmatprep.subr.bf16.mxu0 %v843_v45  ;;  %v853_v56 = vcombine.high %v282_v53, %v286_v54  ;;  %v290_v58 = vld [vmem:[%s1131_s4 + $0x88] sm:$0xff]  ;;  %584 = vmatprep.subr.bf16.mxu1 %v845_v50  ;;  %v850_v60 = vcombine.low %v281_v48, %v285_v49  ;;  %v283_v31 = vld [vmem:[%s1131_s4 + $0x50] sm:$0xff]  ;;  %s841_s8 = sshll.u32 %s1225_s7, 3 }
  0x34   : > { %v293_v57 = vld [vmem:[%s1131_s4 + $0xa0] sm:$0xff]  ;;  %v294_v59 = vld [vmem:[%s1131_s4 + $0xa8] sm:$0xff]  ;;  %544 = vmatpush1.bf16.msra.mxu0 %v842_v47  ;;  %585 = vmatpush1.bf16.msra.mxu1 %v844_v51  ;;  %v852_v61 = vcombine.low %v282_v53, %v286_v54  ;;  %v849_v30 = vcombine.high %v276_v25, %v280_v26  ;;  %v287_v32 = vld [vmem:[%s1131_s4 + $0x70] sm:$0xff]  ;;  %v848_v37 = vcombine.low %v276_v25, %v280_v26  ;;  %s1197_s11 = scalar_lea.vmem %s1220_s3, %s841_s8 }
  0x35   : > { %545 = vmatprep.subr.bf16.mxu0 %v851_v52  ;;  %v859_v62 = vcombine.high %v289_v55, %v293_v57  ;;  %v297_v63 = vld [vmem:[%s1131_s4 + $0xc0] sm:$0xff]  ;;  %586 = vmatprep.subr.bf16.mxu1 %v853_v56  ;;  %v861_v1 = vcombine.high %v290_v58, %v294_v59  ;;  %v298_v2 = vld [vmem:[%s1131_s4 + $0xc8] sm:$0xff]  ;;  %v858_v10 = vcombine.low %v289_v55, %v293_v57  ;;  %v284_v33 = vld [vmem:[%s1131_s4 + $0x58] sm:$0xff] }
  0x36   : > { %v301_v0 = vld [vmem:[%s1131_s4 + $0xe0] sm:$0xff]  ;;  %v302_v5 = vld [vmem:[%s1131_s4 + $0xe8] sm:$0xff]  ;;  %v860_v11 = vcombine.low %v290_v58, %v294_v59  ;;  %v288_v34 = vld [vmem:[%s1131_s4 + $0x78] sm:$0xff]  ;;  %v855_v38 = vcombine.high %v283_v31, %v287_v32  ;;  %v854_v45 = vcombine.low %v283_v31, %v287_v32 }
  0x37   : > { %v305_v3 = vld [vmem:[%s1131_s4 + $0x100] sm:$0xff]  ;;  %v306_v8 = vld [vmem:[%s1131_s4 + $0x108] sm:$0xff]  ;;  %v867_v12 = vcombine.high %v297_v63, %v301_v0  ;;  %v869_v14 = vcombine.high %v298_v2, %v302_v5  ;;  %v866_v17 = vcombine.low %v297_v63, %v301_v0  ;;  %v868_v19 = vcombine.low %v298_v2, %v302_v5  ;;  %v291_v40 = vld [vmem:[%s1131_s4 + $0x90] sm:$0xff] }
  0x38   : > { %v309_v4 = vld [vmem:[%s1131_s4 + $0x120] sm:$0x33]  ;;  %v310_v9 = vld [vmem:[%s1131_s4 + $0x128] sm:$0x33]  ;;  %546 = vmatpush1.bf16.msra.mxu0 %v850_v60  ;;  %587 = vmatpush1.bf16.msra.mxu1 %v852_v61  ;;  %v857_v39 = vcombine.high %v284_v33, %v288_v34  ;;  %v295_v42 = vld [vmem:[%s1131_s4 + $0xb0] sm:$0xff]  ;;  %v856_v46 = vcombine.low %v284_v33, %v288_v34 }
  0x39   : > { %547 = vmatprep.subr.bf16.mxu0 %v859_v62  ;;  %v875_v13 = vcombine.high %v305_v3, %v309_v4  ;;  %588 = vmatprep.subr.bf16.mxu1 %v861_v1  ;;  %v877_v16 = vcombine.high %v306_v8, %v310_v9  ;;  %v874_v18 = vcombine.low %v305_v3, %v309_v4  ;;  %v292_v43 = vld [vmem:[%s1131_s4 + $0x98] sm:$0xff]  ;;  %v299_v48 = vld [vmem:[%s1131_s4 + $0xd0] sm:$0xff] }
  0x3a   : > { %v876_v21 = vcombine.low %v306_v8, %v310_v9  ;;  %v296_v44 = vld [vmem:[%s1131_s4 + $0xb8] sm:$0xff]  ;;  %v863_v47 = vcombine.high %v291_v40, %v295_v42  ;;  %v303_v49 = vld [vmem:[%s1131_s4 + $0xf0] sm:$0xff]  ;;  %v862_v57 = vcombine.low %v291_v40, %v295_v42 }
  0x3b   : > { %v523_v20 = vand.u32 %v875_v13, %v1153_v15  ;;  %v529_v22 = vand.u32 %v877_v16, %v1153_v15  ;;  %v520_v27 = vand.u32 %v874_v18, %v1153_v15  ;;  %v865_v50 = vcombine.high %v292_v43, %v296_v44  ;;  %v300_v51 = vld [vmem:[%s1131_s4 + $0xd8] sm:$0xff]  ;;  %v307_v52 = vld [vmem:[%s1131_s4 + $0x110] sm:$0xff] }
  0x3c   : > { %548 = vmatpush1.bf16.msra.mxu0 %v858_v10  ;;  %589 = vmatpush1.bf16.msra.mxu1 %v860_v11  ;;  %v526_v28 = vand.u32 %v876_v21, %v1153_v15  ;;  %v311_v53 = vld [vmem:[%s1131_s4 + $0x130] sm:$0x33]  ;;  %v304_v54 = vld [vmem:[%s1131_s4 + $0xf8] sm:$0xff]  ;;  %v864_v58 = vcombine.low %v292_v43, %v296_v44  ;;  %v871_v59 = vcombine.high %v299_v48, %v303_v49 }
  0x3d   : > { %549 = vmatprep.subr.bf16.mxu0 %v867_v12  ;;  %590 = vmatprep.subr.bf16.mxu1 %v869_v14  ;;  %v308_v55 = vld [vmem:[%s1131_s4 + $0x118] sm:$0xff]  ;;  %v879_v60 = vcombine.high %v307_v52, %v311_v53  ;;  %v873_v61 = vcombine.high %v300_v51, %v304_v54  ;;  %v870_v63 = vcombine.low %v299_v48, %v303_v49 }
  0x3e   : > { %v312_v56 = vld [vmem:[%s1131_s4 + $0x138] sm:$0x33]  ;;  %v878_v0 = vcombine.low %v307_v52, %v311_v53  ;;  %v872_v1 = vcombine.low %v300_v51, %v304_v54 }
  0x3f   : > { %v881_v62 = vcombine.high %v308_v55, %v312_v56  ;;  %v535_v2 = vand.u32 %v879_v60, %v1153_v15  ;;  %v880_v3 = vcombine.low %v308_v55, %v312_v56 }
  0x40   : > { %550 = vmatpush1.bf16.msra.mxu0 %v866_v17  ;;  %591 = vmatpush1.bf16.msra.mxu1 %v868_v19  ;;  %v532_v4 = vand.u32 %v878_v0, %v1153_v15 }
  0x41   : > { %551 = vmatprep.subr.bf16.mxu0 %v523_v20  ;;  %592 = vmatprep.subr.bf16.mxu1 %v529_v22  ;;  %v538_v5 = vand.u32 %v880_v3, %v1153_v15 }
  0x44   : > { %552 = vmatpush1.bf16.msra.mxu0 %v520_v27  ;;  %593 = vmatpush1.bf16.msra.mxu1 %v526_v28 }
  0x45   : > { %625 = vmatprep.subr.bf16.mxu0 %v847_v29  ;;  %666 = vmatprep.subr.bf16.mxu1 %v849_v30 }
  0x47   : > { %882 = vmatmul.mubr.msk.bf16.vlgmr.msra.gmra.mrb[0].mxu0 %vm511_vm2, %v272_v35  ;;  %883 = vmatmul.mubr.msk.bf16.vlgmr.msra.gmra.mrb[0].mxu1 %vm511_vm2, %v272_v35 }
  0x48   : > { %626 = vmatpush1.bf16.msra.mxu0 %v846_v36  ;;  %667 = vmatpush1.bf16.msra.mxu1 %v848_v37 }
  0x49   : > { %627 = vmatprep.subr.bf16.mxu0 %v855_v38  ;;  %668 = vmatprep.subr.bf16.mxu1 %v857_v39 }
  0x4a   : > { %657 = vmatprep.mubr.bf16.mxu0 %v982_v41  ;;  %698 = vmatprep.mubr.bf16.mxu1 %v982_v41  ;;  %v541_v41 = vand.u32 %v881_v62, %v1153_v15 }
  0x4c   : > { %628 = vmatpush1.bf16.msra.mxu0 %v854_v45  ;;  %669 = vmatpush1.bf16.msra.mxu1 %v856_v46 }
  0x4d   : > { %629 = vmatprep.subr.bf16.mxu0 %v863_v47  ;;  %670 = vmatprep.subr.bf16.mxu1 %v865_v50 }
  0x50   : > { %630 = vmatpush1.bf16.msra.mxu0 %v862_v57  ;;  %671 = vmatpush1.bf16.msra.mxu1 %v864_v58 }
  0x51   : > { %631 = vmatprep.subr.bf16.mxu0 %v871_v59  ;;  %672 = vmatprep.subr.bf16.mxu1 %v873_v61 }
  0x54   : > { %632 = vmatpush1.bf16.msra.mxu0 %v870_v63  ;;  %673 = vmatpush1.bf16.msra.mxu1 %v872_v1 }
  0x55   : > { %633 = vmatprep.subr.bf16.mxu0 %v535_v2  ;;  %674 = vmatprep.subr.bf16.mxu1 %v541_v41 }
  0x58   : > { %634 = vmatpush1.bf16.msra.mxu0 %v532_v4  ;;  %675 = vmatpush1.bf16.msra.mxu1 %v538_v5 }
  0x5b   : > { %884 = vmatmul.mubr.msk.bf16.vlgmr.msra.gmra.mrb[4].mxu0 %vm511_vm2, %v272_v35  ;;  %885 = vmatmul.mubr.msk.bf16.vlgmr.msra.gmra.mrb[4].mxu1 %vm511_vm2, %v272_v35 }
  0xac   : > { %v317_v6 = vpop.permute.xlu0 %316 }
 0x11a   : > { %v577_v7 = vpop.f32.mrb[0].mxu0  ;;  %v618_v9 = vpop.f32.mrb[0].mxu1 }
 0x11b   : > { %v578_v8 = vadd.f32 %v577_v7, %v317_v6  ;;  %v579_v10 = vpop.f32.mrb[1].mxu0  ;;  %v619_v11 = vadd.f32 %v618_v9, %v317_v6  ;;  %v620_v13 = vpop.f32.mrb[1].mxu1 }
 0x11c   : > { %v580_v12 = vadd.f32 %v579_v10, %v317_v6  ;;  %v581_v14 = vpop.f32.mrb[2].mxu0  ;;  %v621_v17 = vadd.f32 %v620_v13, %v317_v6  ;;  %v622_v15 = vpop.f32.mrb[2].mxu1 }
 0x11d   : > { %v886_v16 = vmul.f32 -1.442695, %v578_v8  ;;  %v582_v18 = vpop.f32.mrb[3].mxu0  ;;  %v888_v19 = vmul.f32 -1.442695, %v619_v11  ;;  %v623_v21 = vpop.f32.mrb[3].mxu1 }
 0x11e   : > { %v887_v20 = vmul.f32 -1.442695, %v580_v12  ;;  %v889_v22 = vmul.f32 -1.442695, %v621_v17 }
 0x11f   : > { %926 = vpow2.f32 %v886_v16 }
 0x120   : > { %928 = vpow2.f32 %v888_v19 }
 0x121   : > { %930 = vpow2.f32 %v887_v20 }
 0x122   : > { %932 = vpow2.f32 %v889_v22 }
 0x129   : > { %v927_v23 = vpop.eup %926 }
 0x12a   : > { %v929_v24 = vpop.eup %928  ;;  %v731_v25 = vadd.f32 1.0, %v927_v23 }
 0x12b   : > { %v931_v26 = vpop.eup %930  ;;  %v733_v27 = vadd.f32 1.0, %v929_v24 }
 0x12c   : > { %v933_v28 = vpop.eup %932  ;;  %934 = vrcp.f32 %v731_v25  ;;  %v732_v29 = vadd.f32 1.0, %v931_v26 }
 0x12d   : > { %936 = vrcp.f32 %v733_v27  ;;  %v734_v30 = vadd.f32 1.0, %v933_v28 }
 0x12e   : > { %938 = vrcp.f32 %v732_v29  ;;  %v659_v31 = vpop.f32.mrb[4].mxu0  ;;  %v700_v33 = vpop.f32.mrb[4].mxu1 }
 0x12f   : > { %940 = vrcp.f32 %v734_v30  ;;  %v660_v32 = vadd.f32 %v659_v31, %v317_v6  ;;  %v661_v34 = vpop.f32.mrb[5].mxu0  ;;  %v701_v35 = vadd.f32 %v700_v33, %v317_v6  ;;  %v702_v37 = vpop.f32.mrb[5].mxu1 }
 0x130   : > { %v662_v36 = vadd.f32 %v661_v34, %v317_v6  ;;  %v663_v38 = vpop.f32.mrb[6].mxu0  ;;  %v703_v40 = vadd.f32 %v702_v37, %v317_v6  ;;  %v704_v42 = vpop.f32.mrb[6].mxu1 }
 0x131   : > { %v890_v39 = vmul.f32 -1.442695, %v660_v32  ;;  %v664_v43 = vpop.f32.mrb[7].mxu0  ;;  %v892_v44 = vmul.f32 -1.442695, %v701_v35  ;;  %v705_v46 = vpop.f32.mrb[7].mxu1 }
 0x132   : > { %v891_v45 = vmul.f32 -1.442695, %v662_v36  ;;  %v893_v47 = vmul.f32 -1.442695, %v703_v40 }
 0x133   : > { %942 = vpow2.f32 %v890_v39 }
 0x134   : > { %944 = vpow2.f32 %v892_v44 }
 0x135   : > { %946 = vpow2.f32 %v891_v45 }
 0x136   : > { %v935_v48 = vpop.eup %934  ;;  %948 = vpow2.f32 %v893_v47 }
 0x137   : > { %v937_v49 = vpop.eup %936  ;;  %v755_v50 = vmul.f32 %v935_v48, %v578_v8 }
 0x138   : > { %v939_v51 = vpop.eup %938  ;;  %v757_v52 = vmul.f32 %v937_v49, %v619_v11 }
 0x139   : > { %v941_v53 = vpop.eup %940  ;;  %763 = vst [vmem:[%s1197_s11] sm:$0xff] %v755_v50  ;;  %v756_v54 = vmul.f32 %v939_v51, %v580_v12 }
 0x13a   : > { %765 = vst [vmem:[%s1197_s11 + $0x10] sm:$0xff] %v757_v52  ;;  %v758_v55 = vmul.f32 %v941_v53, %v621_v17 }
 0x13b   : > { %764 = vst [vmem:[%s1197_s11 + $0x8] sm:$0xff] %v756_v54 }
 0x13c   : > { %766 = vst [vmem:[%s1197_s11 + $0x18] sm:$0xff] %v758_v55 }
 0x13d   : > { %v943_v56 = vpop.eup %942 }
 0x13e   : > { %v945_v57 = vpop.eup %944  ;;  %v735_v58 = vadd.f32 1.0, %v943_v56 }
 0x13f   : > { %v947_v59 = vpop.eup %946  ;;  %v737_v60 = vadd.f32 1.0, %v945_v57 }
 0x140   : > { %v949_v61 = vpop.eup %948  ;;  %950 = vrcp.f32 %v735_v58  ;;  %v736_v62 = vadd.f32 1.0, %v947_v59 }
 0x141   : > { %952 = vrcp.f32 %v737_v60  ;;  %v738_v63 = vadd.f32 1.0, %v949_v61 }
 0x142   : > { %954 = vrcp.f32 %v736_v62 }
 0x143   : > { %956 = vrcp.f32 %v738_v63 }
 0x14a   : > { %v951_v0 = vpop.eup %950 }
 0x14b   : > { %v953_v1 = vpop.eup %952  ;;  %v759_v2 = vmul.f32 %v951_v0, %v660_v32 }
 0x14c   : > { %v955_v3 = vpop.eup %954  ;;  %v761_v41 = vmul.f32 %v953_v1, %v701_v35 }
 0x14d   : > { %v957_v4 = vpop.eup %956  ;;  %767 = vst [vmem:[%s1197_s11 + $0x20] sm:$0xff] %v759_v2  ;;  %v760_v5 = vmul.f32 %v955_v3, %v662_v36 }
 0x14e   : > { %769 = vst [vmem:[%s1197_s11 + $0x30] sm:$0xff] %v761_v41  ;;  %v762_v6 = vmul.f32 %v957_v4, %v703_v40 }
 0x14f   : > { %768 = vst [vmem:[%s1197_s11 + $0x28] sm:$0xff] %v760_v5 }
 0x150   : > { %770 = vst [vmem:[%s1197_s11 + $0x38] sm:$0xff] %v762_v6 }
 0x151 PF: > { %p10_p9 = scmp.ge.s32.totalorder %s1021_s16, 4   ;;  %s1221_s12 = smov %s976_s13 }
 0x152   : > { %s1222_s13 = smov %s1030_s19  ;;  %s1223_s14 = smov %s1021_s16 }
 0x153   :  { %12 = sbr.rel (!%p10_p9) target bundleno = 2 (0x2), region = 90 }

// kernel: net_forward.6
= control target key start
LH: loop header
LB: loop body
LE: loop exit
PB: predicated region body
PF: predicated region fallthrough
CT: control target
= control target key end

     0   :  { %s138_s0 = inlined_call_operand.vmem [shape: f32[8,512], index: 0, kind: input, shape index: {}]   ;;  %s139_s1 = inlined_call_operand.vmem [shape: f32[8,512], index: 1, kind: input, shape index: {}]   ;;  %s140_s2 = inlined_call_operand.vmem [shape: f32[8,512], index: 2, kind: input, shape index: {}]   ;;  %s141_s3 = inlined_call_operand.vmem [shape: f32[8,512], index: 3, kind: input, shape index: {}]   ;;  %s142_s4 = inlined_call_operand.vmem [shape: f32[8,512], index: 4, kind: output, shape index: {}]  }
   0x1   :  { %v17_v0 = vld [vmem:[%s138_s0] sm:$0xff]  ;;  %v18_v5 = vld [vmem:[%s138_s0 + $0x8] sm:$0xff]  ;;  %v19_v11 = vld [vmem:[%s138_s0 + $0x10] sm:$0xff] }
   0x2   :  { %v21_v1 = vld [vmem:[%s139_s1] sm:$0xff]  ;;  %v22_v6 = vld [vmem:[%s139_s1 + $0x8] sm:$0xff]  ;;  %v23_v13 = vld [vmem:[%s139_s1 + $0x10] sm:$0xff] }
   0x3   :  { %v29_v2 = vld [vmem:[%s140_s2] sm:$0xff]  ;;  %v25_v3 = vmax.f32 %v17_v0, %v21_v1  ;;  %v26_v8 = vmax.f32 %v18_v5, %v22_v6  ;;  %v30_v9 = vld [vmem:[%s140_s2 + $0x8] sm:$0xff]  ;;  %v31_v14 = vld [vmem:[%s140_s2 + $0x10] sm:$0xff]  ;;  %v27_v17 = vmax.f32 %v19_v11, %v23_v13 }
   0x4   :  { %v33_v4 = vld [vmem:[%s141_s3] sm:$0xff]  ;;  %v34_v10 = vld [vmem:[%s141_s3 + $0x8] sm:$0xff]  ;;  %v35_v15 = vld [vmem:[%s141_s3 + $0x10] sm:$0xff] }
   0x5   :  { %v37_v7 = vmax.f32 %v29_v2, %v33_v4  ;;  %v38_v12 = vmax.f32 %v30_v9, %v34_v10  ;;  %v39_v18 = vmax.f32 %v31_v14, %v35_v15  ;;  %v20_v19 = vld [vmem:[%s138_s0 + $0x18] sm:$0xff] }
   0x6   :  { %v24_v20 = vld [vmem:[%s139_s1 + $0x18] sm:$0xff] }
   0x7   :  { %v41_v16 = vmax.f32 %v25_v3, %v37_v7  ;;  %v32_v21 = vld [vmem:[%s140_s2 + $0x18] sm:$0xff]  ;;  %v42_v22 = vmax.f32 %v26_v8, %v38_v12  ;;  %v28_v23 = vmax.f32 %v20_v19, %v24_v20  ;;  %v43_v25 = vmax.f32 %v27_v17, %v39_v18 }
   0x8   :  { %v36_v24 = vld [vmem:[%s141_s3 + $0x18] sm:$0xff] }
   0x9   :  { %45 = vst [vmem:[%s142_s4] sm:$0xff] %v41_v16  ;;  %v40_v26 = vmax.f32 %v32_v21, %v36_v24  ;;  %46 = vst [vmem:[%s142_s4 + $0x8] sm:$0xff] %v42_v22 }
   0xa   :  { %47 = vst [vmem:[%s142_s4 + $0x10] sm:$0xff] %v43_v25 }
   0xb   :  { %v44_v27 = vmax.f32 %v28_v23, %v40_v26 }
   0xd   :  { %48 = vst [vmem:[%s142_s4 + $0x18] sm:$0xff] %v44_v27 }

// kernel: net_forward.7
= control target key start
LH: loop header
LB: loop body
LE: loop exit
PB: predicated region body
PF: predicated region fallthrough
CT: control target
= control target key end

     0   :  { %s826_s12 = smov 0   ;;  %s828_s13 = smov 0   ;;  %s983_s0 = inlined_call_operand.vmem [shape: bf16[16,200], index: 0, kind: input, shape index: {}]   ;;  %s984_s1 = inlined_call_operand.vmem [shape: bf16[200,512], index: 1, kind: input, shape index: {}]   ;;  %s985_s2 = inlined_call_operand.vmem [shape: f32[16,1], index: 2, kind: input, shape index: {}]   ;;  %s986_s3 = inlined_call_operand.vmem [shape: f32[16,512], index: 3, kind: output, shape index: {}]  }
   0x1   :  { %s830_s14 = smov 0  }
   0x2 LB: > { %s647_s15 = sadd.s32 4294967295, %s803_s14   ;;  %s843_s16 = sadd.s32 1, %s803_s14   ;;  %s803_s14 = sphi %s830_s14, %s990_s14   ;;  %s799_s13 = sphi %s828_s13, %s989_s13   ;;  %s795_s12 = sphi %s826_s12, %s988_s12  }
   0x3   : > { %s38_s17 = ssub.s32 %s803_s14, %s843_s16  ;;  %s41_s18 = sadd.s32 1, %s799_s13 }
   0x4   : > { %p39_p0 = scmp.eq.s32.totalorder %s38_s17, 0  ;;  %p48_p1 = scmp.ne.s32.totalorder %s799_s13, %s795_s12 }
   0x5   : > { %p49_p2 = scmp.eq.s32.totalorder %s803_s14, 0  ;;  %p99_p3 = scmp.eq.s32.totalorder %s647_s15, 1 }
   0x6   : > { %s854_s19 = scalar_select %p39_p0, %s799_s13, %s41_s18  }
   0x7   : > { %p50_p4 = por %p49_p2, %p48_p1  ;;  %p856_p5 = por %p99_p3, %p48_p1 }
   0x8   : > { %p650_p6 = scmp.ge.s32.totalorder %s803_s14, 2 }
   0xa   : > { %127 = sbr.rel (%p650_p6) target bundleno = 34 (0x22), region = 24 }
  0x11   : > { %130 = sbr.rel (!%p50_p4) target bundleno = 34 (0x22), region = 28  ;;  %s132_s21 = sand.u32 (%p50_p4), 1, %s799_s13  }
  0x12   : > { %s694_s22 = sshll.u32 (%p50_p4), %s803_s14, 3  ;;  %s696_s23 = smul.u32 (%p50_p4), 200, %s132_s21 }
  0x13   : > { %s866_s26 = scalar_lea.vmem (%p50_p4), %s984_s1, %s694_s22 }
  0x14   : > { %v213_v0 = vld [vmem:[%s866_s26] sm:$0xff] (%p50_p4)  ;;  %v215_v1 = vld [vmem:[%s866_s26 + $0x10] sm:$0xff] (%p50_p4)  ;;  %s874_s27 = scalar_lea.vmem (%p50_p4), [#allocation2], %s696_s23 }
  0x15   : > { %v217_v2 = vld [vmem:[%s866_s26 + $0x20] sm:$0xff] (%p50_p4)  ;;  %v219_v3 = vld [vmem:[%s866_s26 + $0x30] sm:$0xff] (%p50_p4)  ;;  %214 = vst [vmem:[%s874_s27] sm:$0xff] (%p50_p4), %v213_v0  ;;  %216 = vst [vmem:[%s874_s27 + $0x8] sm:$0xff] (%p50_p4), %v215_v1 }
  0x16   : > { %v221_v4 = vld [vmem:[%s866_s26 + $0x40] sm:$0xff] (%p50_p4)  ;;  %v223_v5 = vld [vmem:[%s866_s26 + $0x50] sm:$0xff] (%p50_p4)  ;;  %218 = vst [vmem:[%s874_s27 + $0x10] sm:$0xff] (%p50_p4), %v217_v2  ;;  %220 = vst [vmem:[%s874_s27 + $0x18] sm:$0xff] (%p50_p4), %v219_v3 }
  0x17   : > { %222 = vst [vmem:[%s874_s27 + $0x20] sm:$0xff] (%p50_p4), %v221_v4  ;;  %224 = vst [vmem:[%s874_s27 + $0x28] sm:$0xff] (%p50_p4), %v223_v5  ;;  %v225_v6 = vld [vmem:[%s866_s26 + $0x60] sm:$0xff] (%p50_p4)  ;;  %v227_v7 = vld [vmem:[%s866_s26 + $0x70] sm:$0xff] (%p50_p4) }
  0x18   : > { %v229_v8 = vld [vmem:[%s866_s26 + $0x80] sm:$0xff]  ;;  %226 = vst [vmem:[%s874_s27 + $0x30] sm:$0xff] %v225_v6  ;;  %228 = vst [vmem:[%s874_s27 + $0x38] sm:$0xff] %v227_v7  ;;  %v231_v9 = vld [vmem:[%s866_s26 + $0x90] sm:$0xff] }
  0x19   : > { %230 = vst [vmem:[%s874_s27 + $0x40] sm:$0xff] %v229_v8  ;;  %v233_v10 = vld [vmem:[%s866_s26 + $0xa0] sm:$0xff]  ;;  %v235_v11 = vld [vmem:[%s866_s26 + $0xb0] sm:$0xff]  ;;  %232 = vst [vmem:[%s874_s27 + $0x48] sm:$0xff] %v231_v9 }
  0x1a   : > { %234 = vst [vmem:[%s874_s27 + $0x50] sm:$0xff] %v233_v10  ;;  %236 = vst [vmem:[%s874_s27 + $0x58] sm:$0xff] %v235_v11  ;;  %v237_v12 = vld [vmem:[%s866_s26 + $0xc0] sm:$0xff]  ;;  %v239_v13 = vld [vmem:[%s866_s26 + $0xd0] sm:$0xff] }
  0x1b   : > { %v241_v14 = vld [vmem:[%s866_s26 + $0xe0] sm:$0xff]  ;;  %238 = vst [vmem:[%s874_s27 + $0x60] sm:$0xff] %v237_v12  ;;  %240 = vst [vmem:[%s874_s27 + $0x68] sm:$0xff] %v239_v13  ;;  %v243_v15 = vld [vmem:[%s866_s26 + $0xf0] sm:$0xff] }
  0x1c   : > { %242 = vst [vmem:[%s874_s27 + $0x70] sm:$0xff] %v241_v14  ;;  %v245_v16 = vld [vmem:[%s866_s26 + $0x100] sm:$0xff]  ;;  %v247_v17 = vld [vmem:[%s866_s26 + $0x110] sm:$0xff]  ;;  %244 = vst [vmem:[%s874_s27 + $0x78] sm:$0xff] %v243_v15 }
  0x1d   : > { %246 = vst [vmem:[%s874_s27 + $0x80] sm:$0xff] %v245_v16  ;;  %248 = vst [vmem:[%s874_s27 + $0x88] sm:$0xff] %v247_v17  ;;  %v249_v18 = vld [vmem:[%s866_s26 + $0x120] sm:$0xff]  ;;  %v251_v19 = vld [vmem:[%s866_s26 + $0x130] sm:$0xff] }
  0x1e   : > { %v253_v20 = vld [vmem:[%s866_s26 + $0x140] sm:$0xff]  ;;  %250 = vst [vmem:[%s874_s27 + $0x90] sm:$0xff] %v249_v18  ;;  %252 = vst [vmem:[%s874_s27 + $0x98] sm:$0xff] %v251_v19  ;;  %v255_v21 = vld [vmem:[%s866_s26 + $0x150] sm:$0xff] }
  0x1f   : > { %254 = vst [vmem:[%s874_s27 + $0xa0] sm:$0xff] %v253_v20  ;;  %v257_v22 = vld [vmem:[%s866_s26 + $0x160] sm:$0xff]  ;;  %v259_v23 = vld [vmem:[%s866_s26 + $0x170] sm:$0xff]  ;;  %256 = vst [vmem:[%s874_s27 + $0xa8] sm:$0xff] %v255_v21 }
  0x20   : > { %258 = vst [vmem:[%s874_s27 + $0xb0] sm:$0xff] %v257_v22  ;;  %260 = vst [vmem:[%s874_s27 + $0xb8] sm:$0xff] %v259_v23  ;;  %v261_v24 = vld [vmem:[%s866_s26 + $0x180] sm:$0xff] }
  0x21   : > { %262 = vst [vmem:[%s874_s27 + $0xc0] sm:$0xff] %v261_v24 }
  0x22 PF: > { %p653_p7 = scmp.ge.s32.totalorder %s803_s14, 1  ;;  %p267_p8 = scmp.lt.s32.totalorder %s803_s14, 3 }
  0x24   : > { %p268_p9 = pnand %p653_p7, %p267_p8 }
  0x25   : > { %s274_s28 = sand.u32 (!%p268_p9), 1, %s795_s12   ;;  %v764_v25 = vld [vmem:[%s983_s0 + $0x4] ss:$8 sps:$4 sm:$0xff] (!%p268_p9)   ;;  %vm472_vm0 = vcmask (!%p268_p9), 588800   ;;  %v805_v27 = vmov (!%p268_p9), 0   ;;  %vm476_vm1 = vcmask (!%p268_p9), 1043456  }
  0x26   : > { %271 = sbr.rel (%p268_p9) target bundleno = 349 (0x15d), region = 66  ;;  %v326_v26 = vld [vmem:[%s985_s2] sm:$0xff] (!%p268_p9)  ;;  %723 = vset.pattern.permute.xlu0 (!%p268_p9), %v805_v27  ;;  %684 = vmatprep.mubr.msk.bf16.mxu0 (!%p268_p9), %vm472_vm0, %v764_v25  ;;  %v327_v28 = vld [vmem:[%s985_s2 + $0x8] sm:$0xff] (!%p268_p9)  ;;  %s654_s17 = sshll.u32 (!%p268_p9), %s274_s28, 5 }
  0x27   : > { %s697_s29 = smul.u32 (!%p268_p9), 200, %s274_s28  ;;  %330 = vperm.xlu0 (!%p268_p9), %723, %v326_v26   ;;  %v762_v57 = vld [vmem:[%s983_s0] ss:$8 sps:$4 sm:$0xff] (!%p268_p9)   ;;  %s295_s18 = scalar_lea.vmem (!%p268_p9), [#allocation3], %s654_s17 }
  0x29   : > { %s934_s9 = scalar_lea.vmem (!%p268_p9), [#allocation2], %s697_s29 }
  0x2a   : > { %v724_v29 = vld [vmem:[%s934_s9 + $0x4] ss:$8 sps:$4 sm:$0xff] (!%p268_p9)   ;;  %v726_v30 = vld [vmem:[%s934_s9] ss:$8 sps:$4 sm:$0xff] (!%p268_p9)   ;;  %v727_v31 = vld [vmem:[%s934_s9 + $0x14] ss:$8 sps:$4 sm:$0xff] (!%p268_p9)  }
  0x2b   : > { %483 = vmatprep.subr.bf16.mxu0 (!%p268_p9), %v724_v29  ;;  %v729_v32 = vld [vmem:[%s934_s9 + $0x10] ss:$8 sps:$4 sm:$0xff] (!%p268_p9)   ;;  %335 = vperm.xlu0 (!%p268_p9), %723, %v327_v28   ;;  %v730_v33 = vld [vmem:[%s934_s9 + $0x24] ss:$8 sps:$4 sm:$0xff] (!%p268_p9)   ;;  %v732_v34 = vld [vmem:[%s934_s9 + $0x20] ss:$8 sps:$4 sm:$0xff] (!%p268_p9)  }
  0x2c   : > { %484 = vmatpush1.bf16.msra.mxu0 (!%p268_p9), %v726_v30  ;;  %v733_v35 = vld [vmem:[%s934_s9 + $0x34] ss:$8 sps:$4 sm:$0xff] (!%p268_p9)   ;;  %v735_v36 = vld [vmem:[%s934_s9 + $0x30] ss:$8 sps:$4 sm:$0xff] (!%p268_p9)   ;;  %v736_v37 = vld [vmem:[%s934_s9 + $0x44] ss:$8 sps:$4 sm:$0xff] (!%p268_p9)  }
  0x2d   : > { %485 = vmatprep.subr.bf16.mxu0 %v727_v31  ;;  %v738_v38 = vld [vmem:[%s934_s9 + $0x40] ss:$8 sps:$4 sm:$0xff]   ;;  %v739_v39 = vld [vmem:[%s934_s9 + $0x54] ss:$8 sps:$4 sm:$0xff]   ;;  %v741_v40 = vld [vmem:[%s934_s9 + $0x50] ss:$8 sps:$4 sm:$0xff]  }
  0x2e   : > { %v742_v41 = vld [vmem:[%s934_s9 + $0x64] ss:$8 sps:$4 sm:$0xff]   ;;  %v744_v42 = vld [vmem:[%s934_s9 + $0x60] ss:$8 sps:$4 sm:$0xff]   ;;  %v745_v43 = vld [vmem:[%s934_s9 + $0x74] ss:$8 sps:$4 sm:$0xff]  }
  0x2f   : > { %v747_v44 = vld [vmem:[%s934_s9 + $0x70] ss:$8 sps:$4 sm:$0xff]   ;;  %v748_v45 = vld [vmem:[%s934_s9 + $0x84] ss:$8 sps:$4 sm:$0xff]   ;;  %v750_v46 = vld [vmem:[%s934_s9 + $0x80] ss:$8 sps:$4 sm:$0xff]  }
  0x30   : > { %486 = vmatpush1.bf16.msra.mxu0 %v729_v32  ;;  %v751_v47 = vld [vmem:[%s934_s9 + $0x94] ss:$8 sps:$4 sm:$0xff]   ;;  %v753_v48 = vld [vmem:[%s934_s9 + $0x90] ss:$8 sps:$4 sm:$0xff]   ;;  %v754_v49 = vld [vmem:[%s934_s9 + $0xa4] ss:$8 sps:$4 sm:$0xff]  }
  0x31   : > { %487 = vmatprep.subr.bf16.mxu0 %v730_v33  ;;  %v756_v50 = vld [vmem:[%s934_s9 + $0xa0] ss:$8 sps:$4 sm:$0xff]   ;;  %v757_v51 = vld [vmem:[%s934_s9 + $0xb4] ss:$8 sps:$4 sm:$0xff]   ;;  %v759_v53 = vld [vmem:[%s934_s9 + $0xb0] ss:$8 sps:$4 sm:$0xff]  }
  0x32   : > { %v325_v52 = vld [vmem:[%s934_s9 + $0xc0] sm:$0xff]  ;;  %s695_s12 = sshll.u32 (%p856_p5), %s647_s15, 4 }
  0x33   : > { %v682_v54 = vcombine.high %v325_v52, %v325_v52  ;;  %v681_v55 = vcombine.low %v325_v52, %v325_v52  ;;  %s567_s23 = scalar_lea.vmem (%p856_p5), %s986_s3, %s695_s12 }
  0x34   : > { %488 = vmatpush1.bf16.msra.mxu0 %v732_v34 }
  0x35   : > { %489 = vmatprep.subr.bf16.mxu0 %v733_v35  ;;  %v478_v56 = vsel %vm476_vm1, %v681_v55, 0 }
  0x38   : > { %490 = vmatpush1.bf16.msra.mxu0 %v735_v36 }
  0x39   : > { %491 = vmatprep.subr.bf16.mxu0 %v736_v37 }
  0x3c   : > { %492 = vmatpush1.bf16.msra.mxu0 %v738_v38 }
  0x3d   : > { %493 = vmatprep.subr.bf16.mxu0 %v739_v39 }
  0x40   : > { %494 = vmatpush1.bf16.msra.mxu0 %v741_v40 }
  0x41   : > { %495 = vmatprep.subr.bf16.mxu0 %v742_v41 }
  0x44   : > { %496 = vmatpush1.bf16.msra.mxu0 %v744_v42 }
  0x45   : > { %497 = vmatprep.subr.bf16.mxu0 %v745_v43 }
  0x48   : > { %498 = vmatpush1.bf16.msra.mxu0 %v747_v44 }
  0x49   : > { %499 = vmatprep.subr.bf16.mxu0 %v748_v45 }
  0x4c   : > { %500 = vmatpush1.bf16.msra.mxu0 %v750_v46 }
  0x4d   : > { %501 = vmatprep.subr.bf16.mxu0 %v751_v47 }
  0x50   : > { %502 = vmatpush1.bf16.msra.mxu0 %v753_v48 }
  0x51   : > { %503 = vmatprep.subr.bf16.mxu0 %v754_v49 }
  0x54   : > { %504 = vmatpush1.bf16.msra.mxu0 %v756_v50 }
  0x55   : > { %505 = vmatprep.subr.bf16.mxu0 %v757_v51 }
  0x58   : > { %506 = vmatpush1.bf16.msra.mxu0 %v759_v53 }
  0x59   : > { %683 = vmatprep.subr.msk.bf16.mxu0 %vm476_vm1, %v682_v54 }
  0x5c   : > { %508 = vmatpush1.bf16.msra.mxu0 %v478_v56 }
  0x5f   : > { %516 = vmatmul.mubr.bf16.vlgmr.msra.gmra.mrb[0].mxu0 %v762_v57 }
  0xa6   : > { %v331_v58 = vpop.permute.xlu0 %330 }
  0xaa   : > { %v336_v62 = vpop.permute.xlu0 %335 }
 0x132   : > { %v517_v59 = vpop.f32.mrb[0].mxu0 }
 0x133   : > { %v518_v60 = vadd.f32 %v517_v59, %v331_v58  ;;  %v519_v61 = vpop.f32.mrb[1].mxu0 }
 0x134   : > { %v520_v63 = vadd.f32 %v519_v61, %v331_v58  ;;  %v521_v0 = vpop.f32.mrb[2].mxu0 }
 0x135   : > { %v685_v1 = vmul.f32 -1.442695, %v518_v60  ;;  %v522_v2 = vadd.f32 %v521_v0, %v336_v62  ;;  %v523_v3 = vpop.f32.mrb[3].mxu0 }
 0x136   : > { %v686_v4 = vmul.f32 -1.442695, %v520_v63  ;;  %v524_v5 = vadd.f32 %v523_v3, %v336_v62 }
 0x137   : > { %765 = vpow2.f32 %v685_v1  ;;  %v687_v6 = vmul.f32 -1.442695, %v522_v2 }
 0x138   : > { %767 = vpow2.f32 %v686_v4  ;;  %v688_v7 = vmul.f32 -1.442695, %v524_v5 }
 0x139   : > { %769 = vpow2.f32 %v687_v6 }
 0x13a   : > { %771 = vpow2.f32 %v688_v7 }
 0x141   : > { %v766_v8 = vpop.eup %765 }
 0x142   : > { %v768_v9 = vpop.eup %767  ;;  %v538_v10 = vadd.f32 1.0, %v766_v8 }
 0x143   : > { %v770_v11 = vpop.eup %769  ;;  %v539_v12 = vadd.f32 1.0, %v768_v9 }
 0x144   : > { %v772_v13 = vpop.eup %771  ;;  %773 = vrcp.f32 %v538_v10  ;;  %v540_v14 = vadd.f32 1.0, %v770_v11 }
 0x145   : > { %775 = vrcp.f32 %v539_v12  ;;  %v541_v15 = vadd.f32 1.0, %v772_v13 }
 0x146   : > { %777 = vrcp.f32 %v540_v14 }
 0x147   : > { %779 = vrcp.f32 %v541_v15 }
 0x14e   : > { %v774_v16 = vpop.eup %773  ;;  %564 = sbr.rel (!%p856_p5) target bundleno = 349 (0x15d), region = 74 }
 0x14f   : > { %v776_v17 = vpop.eup %775  ;;  %v550_v18 = vmul.f32 %v774_v16, %v518_v60 }
 0x150   : > { %v778_v19 = vpop.eup %777  ;;  %v551_v20 = vmul.f32 %v776_v17, %v520_v63 }
 0x151   : > { %v780_v21 = vpop.eup %779  ;;  %554 = vst [vmem:[%s295_s18] sm:$0xff] %v550_v18  ;;  %v552_v22 = vmul.f32 %v778_v19, %v522_v2 }
 0x152   : > { %555 = vst [vmem:[%s295_s18 + $0x8] sm:$0xff] %v551_v20  ;;  %v553_v23 = vmul.f32 %v780_v21, %v524_v5 }
 0x153   : > { %556 = vst [vmem:[%s295_s18 + $0x10] sm:$0xff] %v552_v22 }
 0x154   : > { %557 = vst [vmem:[%s295_s18 + $0x18] sm:$0xff] %v553_v23 }
 0x158   : > { %v580_v24 = vld [vmem:[%s295_s18] sm:$0xff] }
 0x159   : > { %v582_v25 = vld [vmem:[%s295_s18 + $0x8] sm:$0xff]  ;;  %581 = vst [vmem:[%s567_s23] sm:$0xff] %v580_v24 }
 0x15a   : > { %v584_v26 = vld [vmem:[%s295_s18 + $0x10] sm:$0xff]  ;;  %583 = vst [vmem:[%s567_s23 + $0x8] sm:$0xff] %v582_v25 }
 0x15b   : > { %v586_v27 = vld [vmem:[%s295_s18 + $0x18] sm:$0xff]  ;;  %585 = vst [vmem:[%s567_s23 + $0x20] sm:$0xff] %v584_v26 }
 0x15c   : > { %587 = vst [vmem:[%s567_s23 + $0x28] sm:$0xff] %v586_v27 }
 0x15d PF: > { %p10_p10 = scmp.ge.s32.totalorder %s843_s16, 4   ;;  %s988_s12 = smov %s799_s13 }
 0x15e   : > { %s989_s13 = smov %s854_s19  ;;  %s990_s14 = smov %s843_s16 }
 0x15f   :  { %12 = sbr.rel (!%p10_p10) target bundleno = 2 (0x2), region = 128 }

// kernel: net_forward.8
= control target key start
LH: loop header
LB: loop body
LE: loop exit
PB: predicated region body
PF: predicated region fallthrough
CT: control target
= control target key end

     0   :  { %s92_s0 = inlined_call_operand.vmem [shape: f32[16,128], index: 0, kind: input, shape index: {}]   ;;  %s93_s1 = inlined_call_operand.vmem [shape: f32[16,128], index: 1, kind: input, shape index: {}]   ;;  %s94_s2 = inlined_call_operand.vmem [shape: f32[16,128], index: 2, kind: input, shape index: {}]   ;;  %s95_s3 = inlined_call_operand.vmem [shape: f32[16,128], index: 3, kind: input, shape index: {}]   ;;  %s96_s4 = inlined_call_operand.vmem [shape: f32[16,128], index: 4, kind: output, shape index: {}]  }
   0x1   :  { %v17_v0 = vld [vmem:[%s92_s0] sm:$0xff]  ;;  %v18_v5 = vld [vmem:[%s92_s0 + $0x8] sm:$0xff] }
   0x2   :  { %v19_v1 = vld [vmem:[%s93_s1] sm:$0xff]  ;;  %v20_v6 = vld [vmem:[%s93_s1 + $0x8] sm:$0xff] }
   0x3   :  { %v23_v2 = vld [vmem:[%s94_s2] sm:$0xff]  ;;  %v21_v3 = vmax.f32 %v17_v0, %v19_v1  ;;  %v22_v8 = vmax.f32 %v18_v5, %v20_v6  ;;  %v24_v9 = vld [vmem:[%s94_s2 + $0x8] sm:$0xff] }
   0x4   :  { %v25_v4 = vld [vmem:[%s95_s3] sm:$0xff]  ;;  %v26_v10 = vld [vmem:[%s95_s3 + $0x8] sm:$0xff] }
   0x5   :  { %v27_v7 = vmax.f32 %v23_v2, %v25_v4  ;;  %v28_v11 = vmax.f32 %v24_v9, %v26_v10 }
   0x7   :  { %v29_v12 = vmax.f32 %v21_v3, %v27_v7  ;;  %v30_v13 = vmax.f32 %v22_v8, %v28_v11 }
   0x9   :  { %31 = vst [vmem:[%s96_s4] sm:$0xff] %v29_v12  ;;  %32 = vst [vmem:[%s96_s4 + $0x8] sm:$0xff] %v30_v13 }

// kernel: net_forward.9
= control target key start
LH: loop header
LB: loop body
LE: loop exit
PB: predicated region body
PF: predicated region fallthrough
CT: control target
= control target key end

     0   :  { %vm817_vm0 = vcmask 1043456   ;;  %vm1277_vm1 = vmmov 0   ;;  %vm813_vm2 = vcmask 982016   ;;  %vm904_vm3 = vcmask 457728   ;;  %s1586_s1 = inlined_call_operand.vmem [shape: bf16[1024,120], index: 1, kind: input, shape index: {}]   ;;  %s1587_s0 = inlined_call_operand.vmem [shape: bf16[8,1024], index: 0, kind: input, shape index: {}]   ;;  %s1588_s3 = inlined_call_operand.vmem [shape: bf16[120,56], index: 3, kind: input, shape index: {}]   ;;  %s1589_s2 = inlined_call_operand.vmem [shape: f32[1,120], index: 2, kind: input, shape index: {}]   ;;  %s1590_s5 = inlined_call_operand.vmem [shape: bf16[56,10], index: 5, kind: input, shape index: {}]   ;;  %s1591_s4 = inlined_call_operand.vmem [shape: f32[1,56], index: 4, kind: input, shape index: {}]   ;;  %s1592_s6 = inlined_call_operand.vmem [shape: f32[1,10], index: 6, kind: input, shape index: {}]   ;;  %s1593_s7 = inlined_call_operand.vmem [shape: f32[8,10], index: 7, kind: output, shape index: {}]  }
   0x1   :  { %v1184_v0 = vld [vmem:[%s1586_s1 + $0x40] sm:$0xff]   ;;  %v1188_v4 = vld [vmem:[%s1586_s1 + $0x48] sm:$0xff]   ;;  %v1192_v8 = vld [vmem:[%s1586_s1 + $0x50] sm:$0xff]   ;;  %vm951_vm4 = vcmask 80896  }
   0x2   :  { %v1185_v1 = vld [vmem:[%s1586_s1 + $0xc0] sm:$0xff]   ;;  %1048 = vmatprep.subr.bf16.mxu0 %v1184_v0  ;;  %v1189_v5 = vld [vmem:[%s1586_s1 + $0xc8] sm:$0xff]   ;;  %v1193_v9 = vld [vmem:[%s1586_s1 + $0xd0] sm:$0xff]  }
   0x3   :  { %v1186_v2 = vld [vmem:[%s1586_s1] sm:$0xff]   ;;  %1070 = vmatprep.subr.bf16.mxu1 %v1185_v1  ;;  %v1190_v6 = vld [vmem:[%s1586_s1 + $0x8] sm:$0xff]   ;;  %v1194_v10 = vld [vmem:[%s1586_s1 + $0x10] sm:$0xff]  }
   0x4   :  { %v1187_v3 = vld [vmem:[%s1586_s1 + $0x80] sm:$0xff]   ;;  %1049 = vmatpush3.bf16.msra.mxu0 %v1186_v2  ;;  %v1191_v7 = vld [vmem:[%s1586_s1 + $0x88] sm:$0xff]   ;;  %v1195_v11 = vld [vmem:[%s1586_s1 + $0x90] sm:$0xff]  }
   0x5   :  { %1071 = vmatpush3.bf16.msra.mxu1 %v1187_v3  ;;  %1050 = vmatprep.subr.bf16.mxu0 %v1188_v4  ;;  %v1196_v12 = vld [vmem:[%s1586_s1 + $0x58] sm:$0xff]   ;;  %v1200_v16 = vld [vmem:[%s1586_s1 + $0x60] sm:$0xff]   ;;  %v1204_v20 = vld [vmem:[%s1586_s1 + $0x68] sm:$0xff]  }
   0x6   :  { %1072 = vmatprep.subr.bf16.mxu1 %v1189_v5  ;;  %v1197_v13 = vld [vmem:[%s1586_s1 + $0xd8] sm:$0xff]   ;;  %v1201_v17 = vld [vmem:[%s1586_s1 + $0xe0] sm:$0xff]   ;;  %v1205_v21 = vld [vmem:[%s1586_s1 + $0xe8] sm:$0xff]  }
   0x7   :  { %v1198_v14 = vld [vmem:[%s1586_s1 + $0x18] sm:$0xff]   ;;  %v1202_v18 = vld [vmem:[%s1586_s1 + $0x20] sm:$0xff]   ;;  %v1206_v22 = vld [vmem:[%s1586_s1 + $0x28] sm:$0xff]  }
   0x8   :  { %1051 = vmatpush3.bf16.msra.mxu0 %v1190_v6  ;;  %v1199_v15 = vld [vmem:[%s1586_s1 + $0x98] sm:$0xff]   ;;  %v1203_v19 = vld [vmem:[%s1586_s1 + $0xa0] sm:$0xff]   ;;  %v1207_v23 = vld [vmem:[%s1586_s1 + $0xa8] sm:$0xff]  }
   0x9   :  { %1073 = vmatpush3.bf16.msra.mxu1 %v1191_v7  ;;  %1052 = vmatprep.subr.bf16.mxu0 %v1192_v8  ;;  %v1208_v24 = vld [vmem:[%s1586_s1 + $0x70] sm:$0xff]   ;;  %v1212_v28 = vld [vmem:[%s1586_s1 + $0x78] sm:$0xff]   ;;  %v27_v32 = vld [vmem:[%s1587_s0] sm:$0xff] }
   0xa   :  { %1074 = vmatprep.subr.bf16.mxu1 %v1193_v9  ;;  %v1209_v25 = vld [vmem:[%s1586_s1 + $0xf0] sm:$0xff]   ;;  %v1213_v29 = vld [vmem:[%s1586_s1 + $0xf8] sm:$0xff]   ;;  %v28_v33 = vld [vmem:[%s1587_s0 + $0x8] sm:$0xff]  ;;  %v958_v34 = vcombine.low %v27_v32, %v27_v32  ;;  %v959_v35 = vcombine.high %v27_v32, %v27_v32 }
   0xb   :  { %v1210_v26 = vld [vmem:[%s1586_s1 + $0x30] sm:$0xff]   ;;  %v1214_v30 = vld [vmem:[%s1586_s1 + $0x38] sm:$0xff]   ;;  %v960_v36 = vcombine.low %v28_v33, %v28_v33  ;;  %v961_v37 = vcombine.high %v28_v33, %v28_v33  ;;  %v1220_v38 = vld [vmem:[%s1586_s1 + $0x140] sm:$0xff]  }
   0xc   :  { %1053 = vmatpush3.bf16.msra.mxu0 %v1194_v10  ;;  %v1211_v27 = vld [vmem:[%s1586_s1 + $0xb0] sm:$0xff]   ;;  %v1215_v31 = vld [vmem:[%s1586_s1 + $0xb8] sm:$0xff]   ;;  %v1221_v39 = vld [vmem:[%s1586_s1 + $0x1c0] sm:$0xff]   ;;  %610 = vmatprep.mubr.bf16.mxu0 %v959_v35 }
   0xd   :  { %1075 = vmatpush3.bf16.msra.mxu1 %v1195_v11  ;;  %1054 = vmatprep.subr.bf16.mxu0 %v1196_v12  ;;  %v1222_v40 = vld [vmem:[%s1586_s1 + $0x100] sm:$0xff]   ;;  %v1224_v42 = vld [vmem:[%s1586_s1 + $0x148] sm:$0xff]   ;;  %v1228_v46 = vld [vmem:[%s1586_s1 + $0x150] sm:$0xff]  }
   0xe   :  { %1076 = vmatprep.subr.bf16.mxu1 %v1197_v13  ;;  %650 = vmatprep.mubr.bf16.mxu1 %v961_v37  ;;  %v1223_v41 = vld [vmem:[%s1586_s1 + $0x180] sm:$0xff]   ;;  %v1225_v43 = vld [vmem:[%s1586_s1 + $0x1c8] sm:$0xff]   ;;  %v1229_v47 = vld [vmem:[%s1586_s1 + $0x1d0] sm:$0xff]   ;;  %v1276_v13 = vmov 0.0  }
   0xf   :  { %v1226_v44 = vld [vmem:[%s1586_s1 + $0x108] sm:$0xff]   ;;  %v1230_v48 = vld [vmem:[%s1586_s1 + $0x110] sm:$0xff]   ;;  %v1232_v50 = vld [vmem:[%s1586_s1 + $0x158] sm:$0xff]  }
  0x10   :  { %1055 = vmatpush3.bf16.msra.mxu0 %v1198_v14  ;;  %v1227_v45 = vld [vmem:[%s1586_s1 + $0x188] sm:$0xff]   ;;  %v1231_v49 = vld [vmem:[%s1586_s1 + $0x190] sm:$0xff]   ;;  %v1233_v51 = vld [vmem:[%s1586_s1 + $0x1d8] sm:$0xff]  }
  0x11   :  { %1077 = vmatpush3.bf16.msra.mxu1 %v1199_v15  ;;  %1056 = vmatprep.subr.bf16.mxu0 %v1200_v16  ;;  %v1234_v52 = vld [vmem:[%s1586_s1 + $0x118] sm:$0xff]   ;;  %v1236_v54 = vld [vmem:[%s1586_s1 + $0x160] sm:$0xff]   ;;  %v1240_v58 = vld [vmem:[%s1586_s1 + $0x168] sm:$0xff]  }
  0x12   :  { %1078 = vmatprep.subr.bf16.mxu1 %v1201_v17  ;;  %v1235_v53 = vld [vmem:[%s1586_s1 + $0x198] sm:$0xff]   ;;  %v1237_v55 = vld [vmem:[%s1586_s1 + $0x1e0] sm:$0xff]   ;;  %v1241_v59 = vld [vmem:[%s1586_s1 + $0x1e8] sm:$0xff]  }
  0x13   :  { %v1238_v56 = vld [vmem:[%s1586_s1 + $0x120] sm:$0xff]   ;;  %v1242_v60 = vld [vmem:[%s1586_s1 + $0x128] sm:$0xff]   ;;  %v1244_v62 = vld [vmem:[%s1586_s1 + $0x170] sm:$0xff]  }
  0x14   :  { %1057 = vmatpush3.bf16.msra.mxu0 %v1202_v18  ;;  %v1239_v57 = vld [vmem:[%s1586_s1 + $0x1a0] sm:$0xff]   ;;  %v1243_v61 = vld [vmem:[%s1586_s1 + $0x1a8] sm:$0xff]   ;;  %v1245_v63 = vld [vmem:[%s1586_s1 + $0x1f0] sm:$0xff]  }
  0x15   :  { %1079 = vmatpush3.bf16.msra.mxu1 %v1203_v19  ;;  %1058 = vmatprep.subr.bf16.mxu0 %v1204_v20  ;;  %v1246_v0 = vld [vmem:[%s1586_s1 + $0x130] sm:$0xff]   ;;  %v1248_v2 = vld [vmem:[%s1586_s1 + $0x178] sm:$0xff]   ;;  %v1256_v12 = vld [vmem:[%s1588_s3] sm:$0xff]  }
  0x16   :  { %1080 = vmatprep.subr.bf16.mxu1 %v1205_v21  ;;  %v1247_v1 = vld [vmem:[%s1586_s1 + $0x1b0] sm:$0xff]   ;;  %v1249_v3 = vld [vmem:[%s1586_s1 + $0x1f8] sm:$0xff]   ;;  %v1257_v14 = vld [vmem:[%s1588_s3 + $0x8] sm:$0xff]  }
  0x17   :  { %v1250_v4 = vld [vmem:[%s1586_s1 + $0x138] sm:$0xff]   ;;  %v29_v6 = vld [vmem:[%s1587_s0 + $0x10] sm:$0xff]  ;;  %v1260_v17 = vld [vmem:[%s1588_s3 + $0x20] sm:$0xff]  }
  0x18   :  { %1059 = vmatpush3.bf16.msra.mxu0 %v1206_v22  ;;  %v1251_v5 = vld [vmem:[%s1586_s1 + $0x1b8] sm:$0xff]   ;;  %v962_v7 = vcombine.low %v29_v6, %v29_v6  ;;  %v963_v8 = vcombine.high %v29_v6, %v29_v6  ;;  %v1258_v15 = vld [vmem:[%s1588_s3 + $0x10] sm:$0xff]   ;;  %v1261_v18 = vld [vmem:[%s1588_s3 + $0x28] sm:$0xff]  }
  0x19   :  { %1081 = vmatpush3.bf16.msra.mxu1 %v1207_v23  ;;  %1060 = vmatprep.subr.bf16.mxu0 %v1208_v24  ;;  %v30_v9 = vld [vmem:[%s1587_s0 + $0x18] sm:$0xff]  ;;  %v1262_v19 = vld [vmem:[%s1588_s3 + $0x30] sm:$0xff]   ;;  %v957_v24 = vld [vmem:[%s1589_s2] ss:$0 sm:$0xff] }
  0x1a   :  { %1082 = vmatprep.subr.bf16.mxu1 %v1209_v25  ;;  %v964_v10 = vcombine.low %v30_v9, %v30_v9  ;;  %v965_v11 = vcombine.high %v30_v9, %v30_v9  ;;  %v1259_v16 = vld [vmem:[%s1588_s3 + $0x18] sm:$0xff]   ;;  %v1042_v6 = vld [vmem:[%s1592_s6] ss:$0 sm:$0xff] }
  0x1b   :  { %v1263_v20 = vld [vmem:[%s1588_s3 + $0x38] ss:$0 sps:$4 sm:$0xff]  }
  0x1c   :  { %1061 = vmatpush3.bf16.msra.mxu0 %v1210_v26  ;;  %v819_v21 = vsel %vm817_vm0, %v1263_v20, 0 }
  0x1d   :  { %1083 = vmatpush3.bf16.msra.mxu1 %v1211_v27  ;;  %1062 = vmatprep.subr.bf16.mxu0 %v1212_v28 }
  0x1e   :  { %1084 = vmatprep.subr.bf16.mxu1 %v1213_v29 }
  0x20   :  { %1063 = vmatpush3.bf16.msra.mxu0 %v1214_v30 }
  0x21   :  { %1085 = vmatpush3.bf16.msra.mxu1 %v1215_v31  ;;  %1092 = vmatprep.subr.bf16.mxu0 %v1220_v38 }
  0x22   :  { %1114 = vmatprep.subr.bf16.mxu1 %v1221_v39 }
  0x23   :  { %611 = vmatmul.mubr.bf16.vlgmr.msra.gmra.mrb[0].mxu0 %v958_v34 }
  0x24   :  { %651 = vmatmul.mubr.bf16.vlgmr.msra.gmra.mrb[0].mxu1 %v960_v36  ;;  %1093 = vmatpush3.bf16.msra.mxu0 %v1222_v40 }
  0x25   :  { %1115 = vmatpush3.bf16.msra.mxu1 %v1223_v41  ;;  %1094 = vmatprep.subr.bf16.mxu0 %v1224_v42 }
  0x26   :  { %1116 = vmatprep.subr.bf16.mxu1 %v1225_v43  ;;  %690 = vmatprep.mubr.bf16.mxu0 %v963_v8 }
  0x27   :  { %730 = vmatprep.mubr.bf16.mxu1 %v965_v11 }
  0x28   :  { %1095 = vmatpush3.bf16.msra.mxu0 %v1226_v44 }
  0x29   :  { %1117 = vmatpush3.bf16.msra.mxu1 %v1227_v45  ;;  %1096 = vmatprep.subr.bf16.mxu0 %v1228_v46 }
  0x2a   :  { %1118 = vmatprep.subr.bf16.mxu1 %v1229_v47 }
  0x2c   :  { %1097 = vmatpush3.bf16.msra.mxu0 %v1230_v48 }
  0x2d   :  { %1119 = vmatpush3.bf16.msra.mxu1 %v1231_v49  ;;  %1098 = vmatprep.subr.bf16.mxu0 %v1232_v50 }
  0x2e   :  { %1120 = vmatprep.subr.bf16.mxu1 %v1233_v51 }
  0x30   :  { %1099 = vmatpush3.bf16.msra.mxu0 %v1234_v52 }
  0x31   :  { %1121 = vmatpush3.bf16.msra.mxu1 %v1235_v53  ;;  %1100 = vmatprep.subr.bf16.mxu0 %v1236_v54  ;;  %v1264_v53 = vld [vmem:[%s1590_s5] sm:$0xff]   ;;  %v1265_v54 = vld [vmem:[%s1590_s5 + $0x8] sm:$0xff]  }
  0x32   :  { %1122 = vmatprep.subr.bf16.mxu1 %v1237_v55  ;;  %v1266_v55 = vld [vmem:[%s1590_s5 + $0x10] sm:$0xff]  }
  0x34   :  { %1101 = vmatpush3.bf16.msra.mxu0 %v1238_v56  ;;  %v1267_v56 = vld [vmem:[%s1590_s5 + $0x18] ss:$0 sps:$4 sm:$0xff]  }
  0x35   :  { %1123 = vmatpush3.bf16.msra.mxu1 %v1239_v57  ;;  %1102 = vmatprep.subr.bf16.mxu0 %v1240_v58  ;;  %v909_v57 = vsel %vm817_vm0, %v1267_v56, 0  ;;  %v1031_v58 = vld [vmem:[%s1591_s4] ss:$0 sm:$0xff] }
  0x36   :  { %1124 = vmatprep.subr.bf16.mxu1 %v1241_v59 }
  0x38   :  { %1103 = vmatpush3.bf16.msra.mxu0 %v1242_v60 }
  0x39   :  { %1125 = vmatpush3.bf16.msra.mxu1 %v1243_v61  ;;  %1104 = vmatprep.subr.bf16.mxu0 %v1244_v62 }
  0x3a   :  { %1126 = vmatprep.subr.bf16.mxu1 %v1245_v63 }
  0x3c   :  { %1105 = vmatpush3.bf16.msra.mxu0 %v1246_v0 }
  0x3d   :  { %1127 = vmatpush3.bf16.msra.mxu1 %v1247_v1  ;;  %1106 = vmatprep.subr.bf16.mxu0 %v1248_v2 }
  0x3e   :  { %1128 = vmatprep.subr.bf16.mxu1 %v1249_v3 }
  0x40   :  { %1107 = vmatpush3.bf16.msra.mxu0 %v1250_v4 }
  0x41   :  { %1129 = vmatpush3.bf16.msra.mxu1 %v1251_v5  ;;  %1150 = vmatprep.subr.bf16.mxu0 %v1276_v13 }
  0x42   :  { %1170 = vmatprep.subr.bf16.mxu1 %v1276_v13 }
  0x43   :  { %691 = vmatmul.mubr.bf16.vlgmr.msra.gmra.mrb[4].mxu0 %v962_v7 }
  0x44   :  { %731 = vmatmul.mubr.bf16.vlgmr.msra.gmra.mrb[4].mxu1 %v964_v10  ;;  %1151 = vmatpush3.bf16.msra.mxu0 %v1256_v12 }
  0x45   :  { %1152 = vmatprep.subr.bf16.mxu0 %v1276_v13  ;;  %1166 = vmatprep.mubr.msk.bf16.mxu0 %vm1277_vm1, %v1276_v13 }
  0x46   :  { %1178 = vmatprep.mubr.msk.bf16.mxu1 %vm1277_vm1, %v1276_v13  ;;  %1171 = vmatpush3.bf16.msra.mxu1 %v1264_v53 }
  0x47   :  { %1172 = vmatprep.subr.bf16.mxu1 %v1276_v13 }
  0x48   :  { %1153 = vmatpush3.bf16.msra.mxu0 %v1257_v14 }
  0x49   :  { %1154 = vmatprep.subr.bf16.mxu0 %v1276_v13 }
  0x4a   :  { %1173 = vmatpush3.bf16.msra.mxu1 %v1265_v54 }
  0x4b   :  { %1174 = vmatprep.subr.bf16.mxu1 %v1276_v13 }
  0x4c   :  { %1155 = vmatpush3.bf16.msra.mxu0 %v1258_v15 }
  0x4d   :  { %1156 = vmatprep.subr.bf16.mxu0 %v1276_v13 }
  0x4e   :  { %1175 = vmatpush3.bf16.msra.mxu1 %v1266_v55 }
  0x4f   :  { %1176 = vmatprep.subr.bf16.mxu1 %v1276_v13 }
  0x50   :  { %1157 = vmatpush3.bf16.msra.mxu0 %v1259_v16 }
  0x51   :  { %1158 = vmatprep.subr.bf16.mxu0 %v1276_v13 }
  0x52   :  { %1177 = vmatpush3.bf16.msra.mxu1 %v909_v57 }
  0x54   :  { %1159 = vmatpush3.bf16.msra.mxu0 %v1260_v17 }
  0x55   :  { %1160 = vmatprep.subr.bf16.mxu0 %v1276_v13 }
  0x58   :  { %1161 = vmatpush3.bf16.msra.mxu0 %v1261_v18 }
  0x59   :  { %1162 = vmatprep.subr.bf16.mxu0 %v1276_v13 }
  0x5c   :  { %1163 = vmatpush3.bf16.msra.mxu0 %v1262_v19 }
  0x5d   :  { %1164 = vmatprep.subr.bf16.mxu0 %v1276_v13 }
  0x60   :  { %1165 = vmatpush3.bf16.msra.mxu0 %v819_v21 }
  0xf6   :  { %v1064_v22 = vpop.f32.mrb[0].mxu0 }
  0xf7   :  { %v1086_v23 = vpop.f32.mrb[0].mxu1  ;;  %v1065_v25 = vpop.f32.mrb[1].mxu0 }
  0xf8   :  { %v1087_v26 = vpop.f32.mrb[1].mxu1  ;;  %v1066_v27 = vadd.f32 %v1065_v25, %v1064_v22  ;;  %v1067_v29 = vpop.f32.mrb[2].mxu0 }
  0xf9   :  { %v1088_v28 = vadd.f32 %v1087_v26, %v1086_v23  ;;  %v1089_v30 = vpop.f32.mrb[2].mxu1  ;;  %v1068_v31 = vpop.f32.mrb[3].mxu0 }
  0xfa   :  { %v1090_v32 = vpop.f32.mrb[3].mxu1  ;;  %v613_v33 = vadd.f32 %v1066_v27, %v957_v24 }
  0xfc   :  { %v653_v34 = vadd.f32 %v1088_v28, %v613_v33 }
 0x116   :  { %v1108_v35 = vpop.f32.mrb[4].mxu0 }
 0x117   :  { %v1130_v36 = vpop.f32.mrb[4].mxu1  ;;  %v1109_v37 = vpop.f32.mrb[5].mxu0 }
 0x118   :  { %v1131_v38 = vpop.f32.mrb[5].mxu1  ;;  %v1110_v39 = vadd.f32 %v1109_v37, %v1108_v35  ;;  %v1111_v41 = vpop.f32.mrb[6].mxu0 }
 0x119   :  { %v1132_v40 = vadd.f32 %v1131_v38, %v1130_v36  ;;  %v1133_v42 = vpop.f32.mrb[6].mxu1  ;;  %v1112_v43 = vpop.f32.mrb[7].mxu0 }
 0x11a   :  { %v1134_v44 = vpop.f32.mrb[7].mxu1  ;;  %v693_v45 = vadd.f32 %v1110_v39, %v653_v34 }
 0x11c   :  { %v733_v46 = vadd.f32 %v1132_v40, %v693_v45 }
 0x11e   :  { %v1030_v47 = vmul.f32 -1.442695, %v733_v46 }
 0x120   :  { %1268 = vpow2.f32 %v1030_v47 }
 0x12a   :  { %v1269_v48 = vpop.eup %1268 }
 0x12b   :  { %v741_v49 = vadd.f32 1.0, %v1269_v48 }
 0x12d   :  { %1270 = vrcp.f32 %v741_v49 }
 0x137   :  { %v1271_v50 = vpop.eup %1270 }
 0x138   :  { %v744_v51 = vmul.f32 %v1271_v50, %v733_v46 }
 0x13a   :  { %v745_v52 = vpack.c.bf16 %v744_v51, %v744_v51 }
 0x13c   :  { %1167 = vmatmul.mubr.msk.bf16.vlgmr.msra.gmra.mrb[8].mxu0 %vm813_vm2, %v745_v52 }
 0x20f   :  { %v855_v59 = vpop.f32.mrb[8].mxu0 }
 0x210   :  { %v856_v60 = vadd.f32 %v1031_v58, %v855_v59  ;;  %v1168_v61 = vpop.f32.mrb[9].mxu0 }
 0x211   :  { %v858_v62 = vpop.f32.mrb[10].mxu0 }
 0x212   :  { %v1041_v63 = vmul.f32 -1.442695, %v856_v60  ;;  %v1169_v0 = vpop.f32.mrb[11].mxu0 }
 0x214   :  { %1272 = vpow2.f32 %v1041_v63 }
 0x21e   :  { %v1273_v1 = vpop.eup %1272 }
 0x21f   :  { %v864_v2 = vadd.f32 1.0, %v1273_v1 }
 0x221   :  { %1274 = vrcp.f32 %v864_v2 }
 0x22b   :  { %v1275_v3 = vpop.eup %1274 }
 0x22c   :  { %v867_v4 = vmul.f32 %v1275_v3, %v856_v60 }
 0x22e   :  { %v868_v5 = vpack.c.bf16 %v867_v4, %v867_v4 }
 0x230   :  { %1179 = vmatmul.mubr.msk.bf16.vlgmr.msra.gmra.mrb[8].mxu1 %vm904_vm3, %v868_v5 }
 0x303   :  { %v945_v7 = vpop.f32.mrb[8].mxu1 }
 0x304   :  { %v946_v8 = vadd.f32 %v1042_v6, %v945_v7  ;;  %v1180_v9 = vpop.f32.mrb[9].mxu1 }
 0x305   :  { %v948_v10 = vpop.f32.mrb[10].mxu1 }
 0x306   :  { %952 = vst.msk [vmem:[%s1593_s7] sm:$0xff] %vm951_vm4, %v946_v8  ;;  %v1181_v11 = vpop.f32.mrb[11].mxu1 }

</bundles_post_ra>
